<compile_context>
chip_gen: v7x
topology: tpu7x:2x2x1
jax: 0.10.0
libtpu: 0.0.40
codegen_flags: <defaults>
</compile_context>

<pallas_src>
import functools
import jax
import jax.numpy as jnp
from jax.experimental import pallas as pl
from jax.experimental.pallas import tpu as pltpu


def _round_up(x, m):
    return ((x + m - 1) // m) * m


# ------------------------------ fused kernel --------------------------------

def fused_conv_bn_relu_kernel(a_ref, w_ref, b_ref, g_ref, be_ref,
                              o_ref, sum_ref, *,
                              tm, m_valid, num_tiles, eps):
    i = pl.program_id(0)
    needs_mask = (m_valid % tm) != 0        # static (trace-time) condition
    cp = o_ref.shape[1]
    unroll = min(num_tiles, 8)              # bounded unroll (LLO visibility)

    @pl.when(i == 0)
    def _():
        sum_ref[...] = jnp.zeros_like(sum_ref)

    # ---- GEMM + bias for this M-tile (K fits one 128-wide block) ----
    y = jnp.dot(a_ref[...], w_ref[...], preferred_element_type=jnp.float32)
    y = y + b_ref[...]

    if needs_mask:
        rows = jax.lax.broadcasted_iota(jnp.int32, (tm, cp), 0) + i * tm
        y_stat = jnp.where(rows < m_valid, y, 0.0)
    else:
        y_stat = y
    # Column sum overlaps with the next tile's MXU work (VPU/XLU slots).
    sum_ref[...] += jnp.sum(y_stat, axis=0, keepdims=True)

    row0 = pl.multiple_of(i * tm, tm)
    o_ref[pl.ds(row0, tm), :] = y           # keep conv output resident in VMEM

    # ---- epilogue: finish BN stats, normalize + affine + ReLU in place ----
    @pl.when(i == num_tiles - 1)
    def _():
        inv_m = 1.0 / m_valid
        mean = sum_ref[...] * inv_m                         # (1, Cp)

        # two-pass (centered) variance over the VMEM-resident conv output
        def css_body(t, acc):
            r0 = pl.multiple_of(t * tm, tm)
            d = o_ref[pl.ds(r0, tm), :] - mean
            if needs_mask:
                rows = jax.lax.broadcasted_iota(jnp.int32, (tm, cp), 0) + t * tm
                d = jnp.where(rows < m_valid, d, 0.0)
            return acc + jnp.sum(d * d, axis=0, keepdims=True)

        css = jax.lax.fori_loop(0, num_tiles, css_body,
                                jnp.zeros_like(mean), unroll=unroll)
        var = css * inv_m                                   # biased (BN norm)
        inv_std = 1.0 / jnp.sqrt(var + eps)
        scale = g_ref[...] * inv_std                        # (1, Cp)
        shift = be_ref[...] - mean * scale                  # (1, Cp)

        def norm_body(t, carry):
            r0 = pl.multiple_of(t * tm, tm)
            blk = o_ref[pl.ds(r0, tm), :]
            o_ref[pl.ds(r0, tm), :] = jnp.maximum(blk * scale + shift, 0.0)
            return carry

        jax.lax.fori_loop(0, num_tiles, norm_body, 0, unroll=unroll)


# -------------------------------- wrapper ------------------------------------

@functools.partial(jax.jit, static_argnames=("stride", "padding", "eps"))
def conv_block_forward(x, w, bias, gamma, beta, *, stride=1, padding=1,
                       eps=1e-5):
    """x: (N, C_in, D, H, W) f32 -> (N, C_out, Do, Ho, Wo) f32."""
    N, C_in, D, H, W = x.shape
    C_out, _, kD, kH, kW = w.shape
    assert kD == kH == kW, "cubic kernel assumed"
    k = kD
    s, p = stride, padding

    Do = (D + 2 * p - k) // s + 1
    Ho = (H + 2 * p - k) // s + 1
    Wo = (W + 2 * p - k) // s + 1
    M = N * Do * Ho * Wo
    K = C_in * k ** 3

    # ---- im2col (plain JAX glue at this toy size) ----
    xpad = jnp.pad(x, ((0, 0), (0, 0), (p, p), (p, p), (p, p)))
    patches = []
    for kd in range(k):
        for kh in range(k):
            for kw_ in range(k):
                patches.append(
                    xpad[:, :,
                         kd:kd + (Do - 1) * s + 1:s,
                         kh:kh + (Ho - 1) * s + 1:s,
                         kw_:kw_ + (Wo - 1) * s + 1:s])
    P = jnp.stack(patches, axis=0)                   # (k^3, N, C_in, Do, Ho, Wo)
    A = P.transpose(1, 3, 4, 5, 2, 0).reshape(M, K)  # col = ci*k^3 + kidx
    W2 = w.reshape(C_out, K).T                       # (K, C_out), same col order

    # ---- TPU-friendly padding / tiling ----
    LANE = 128
    TM = 512 if M >= 512 else _round_up(M, 8)
    Mp = _round_up(M, TM)
    num_tiles = Mp // TM
    Kp = _round_up(K, LANE)
    Cp = _round_up(C_out, LANE)

    A_p = jnp.pad(A, ((0, Mp - M), (0, Kp - K)))
    W_p = jnp.pad(W2, ((0, Kp - K), (0, Cp - C_out)))
    b_p = jnp.pad(bias, (0, Cp - C_out)).reshape(1, Cp)
    g_p = jnp.pad(gamma, (0, Cp - C_out)).reshape(1, Cp)
    be_p = jnp.pad(beta, (0, Cp - C_out)).reshape(1, Cp)

    kernel = functools.partial(
        fused_conv_bn_relu_kernel,
        tm=TM, m_valid=M, num_tiles=num_tiles, eps=eps)

    out_flat = pl.pallas_call(
        kernel,
        out_shape=jax.ShapeDtypeStruct((Mp, Cp), jnp.float32),
        grid_spec=pltpu.PrefetchScalarGridSpec(
            num_scalar_prefetch=0,
            grid=(num_tiles,),
            in_specs=[
                pl.BlockSpec((TM, Kp), lambda i: (i, 0)),   # A tile (pipelined)
                pl.BlockSpec((Kp, Cp), lambda i: (0, 0)),   # W (resident)
                pl.BlockSpec((1, Cp), lambda i: (0, 0)),    # bias
                pl.BlockSpec((1, Cp), lambda i: (0, 0)),    # gamma
                pl.BlockSpec((1, Cp), lambda i: (0, 0)),    # beta
            ],
            # full output resident in VMEM across the grid (accumulator style)
            out_specs=pl.BlockSpec((Mp, Cp), lambda i: (0, 0)),
            scratch_shapes=[pltpu.VMEM((1, Cp), jnp.float32)]),
        compiler_params=pltpu.CompilerParams(
            dimension_semantics=("arbitrary",)),
    )(A_p, W_p, b_p, g_p, be_p)

    # lane-dense channels-last inside the kernel; NCDHW transpose is glue only
    out = out_flat[:M, :C_out].reshape(N, Do, Ho, Wo, C_out)
    return out.transpose(0, 4, 1, 2, 3)


# ------------------------------- reference ----------------------------------

def reference_forward(x, w, bias, gamma, beta, stride=1, padding=1, eps=1e-5):
    conv = jax.lax.conv_general_dilated(
        x, w, window_strides=(stride,) * 3,
        padding=[(padding, padding)] * 3,
        dimension_numbers=("NCDHW", "OIDHW", "NCDHW"))
    conv = conv + bias[None, :, None, None, None]
    mu = conv.mean(axis=(0, 2, 3, 4), keepdims=True)
    var = conv.var(axis=(0, 2, 3, 4), keepdims=True)  # biased
    g = gamma[None, :, None, None, None]
    b = beta[None, :, None, None, None]
    return jnp.maximum((conv - mu) / jnp.sqrt(var + eps) * g + b, 0.0)


# --------------------------------- main --------------------------------------

if __name__ == "__main__":
    # conv_block(input_channel=4, output_channel=8, kernel_size=3, stride=1, padding=1)
    N, C_in, C_out, D, H, W, ksz = 2, 4, 8, 8, 8, 8, 3

    key = jax.random.PRNGKey(0)
    kx, kw, kb, kg, kbe = jax.random.split(key, 5)

    x = jax.random.normal(kx, (N, C_in, D, H, W), dtype=jnp.float32)
    fan_in = C_in * ksz ** 3
    bound = 1.0 / (fan_in ** 0.5)
    w = jax.random.uniform(kw, (C_out, C_in, ksz, ksz, ksz),
                           minval=-bound, maxval=bound, dtype=jnp.float32)
    bias = jax.random.uniform(kb, (C_out,), minval=-bound, maxval=bound,
                              dtype=jnp.float32)
    gamma = 1.0 + 0.1 * jax.random.normal(kg, (C_out,), dtype=jnp.float32)
    beta = 0.1 * jax.random.normal(kbe, (C_out,), dtype=jnp.float32)

    out = conv_block_forward(x, w, bias, gamma, beta, stride=1, padding=1)
    out = jax.block_until_ready(out)

    ref = reference_forward(x, w, bias, gamma, beta, stride=1, padding=1)
    assert out.shape == ref.shape == (N, C_out, D, H, W)
    assert jnp.allclose(out, ref, rtol=1e-4, atol=1e-4), "mismatch vs reference"

    print("KERNEL_OK")
</pallas_src>

<mosaic_0001>
module attributes {stable_mosaic.version = 11 : i64} {
  func.func @fused_conv_bn_relu_kernel(%arg0: i32, %arg1: memref<512x128xf32, #tpu.memory_space<vmem>>, %arg2: memref<128x128xf32, #tpu.memory_space<vmem>>, %arg3: memref<1x128xf32, #tpu.memory_space<vmem>>, %arg4: memref<1x128xf32, #tpu.memory_space<vmem>>, %arg5: memref<1x128xf32, #tpu.memory_space<vmem>>, %arg6: memref<1024x128xf32, #tpu.memory_space<vmem>>, %arg7: memref<1x128xf32, #tpu.memory_space<vmem>>) attributes {dimension_semantics = [#tpu.dimension_semantics<arbitrary>], iteration_bounds = array<i64: 2>, scalar_prefetch = 0 : i64, scratch_operands = 1 : i64, tpu.core_type = #tpu.core_type<tc>, window_params = [{transform_indices = @transform_0, window_bounds = array<i64: 512, 128>}, {pipeline_mode = #tpu.pipeline_mode<synchronous>, transform_indices = @transform_1, window_bounds = array<i64: 128, 128>}, {pipeline_mode = #tpu.pipeline_mode<synchronous>, transform_indices = @transform_2, window_bounds = array<i64: 1, 128>}, {pipeline_mode = #tpu.pipeline_mode<synchronous>, transform_indices = @transform_3, window_bounds = array<i64: 1, 128>}, {pipeline_mode = #tpu.pipeline_mode<synchronous>, transform_indices = @transform_4, window_bounds = array<i64: 1, 128>}, {pipeline_mode = #tpu.pipeline_mode<synchronous>, transform_indices = @transform_5, window_bounds = array<i64: 1024, 128>}]} {
    %c0_i32 = arith.constant 0 : i32
    %0 = arith.cmpi eq, %arg0, %c0_i32 : i32
    %1 = arith.extui %0 : i1 to i32
    %c0_i32_0 = arith.constant 0 : i32
    %2 = arith.cmpi ne, %1, %c0_i32_0 : i32
    scf.if %2 {
      %cst_13 = arith.constant 0.000000e+00 : f32
      %21 = vector.broadcast %cst_13 : f32 to vector<1x128xf32>
      %c0_14 = arith.constant 0 : index
      %c0_15 = arith.constant 0 : index
      %22 = vector.load %arg7[%c0_14, %c0_15] : memref<1x128xf32, #tpu.memory_space<vmem>>, vector<1x128xf32>
      tpu.vector_store %arg7[%c0_14, %c0_15], %21 {strides = array<i32>} : memref<1x128xf32, #tpu.memory_space<vmem>>, vector<1x128xf32>,
    } else {
    }
    %c0 = arith.constant 0 : index
    %c0_1 = arith.constant 0 : index
    %3 = vector.load %arg1[%c0, %c0_1] : memref<512x128xf32, #tpu.memory_space<vmem>>, vector<512x128xf32>
    %c0_2 = arith.constant 0 : index
    %c0_3 = arith.constant 0 : index
    %4 = vector.load %arg2[%c0_2, %c0_3] : memref<128x128xf32, #tpu.memory_space<vmem>>, vector<128x128xf32>
    %cst = arith.constant dense<0.000000e+00> : vector<512x128xf32>
    %5 = tpu.matmul %3, %4, %cst {dimension_numbers = #tpu.dot_dimension_numbers<[1], [0], [0], [1], [0, 0, 1, 1], [], []>} : vector<512x128xf32>, vector<128x128xf32>, vector<512x128xf32> -> vector<512x128xf32>
    %c0_4 = arith.constant 0 : index
    %c0_5 = arith.constant 0 : index
    %6 = vector.load %arg3[%c0_4, %c0_5] : memref<1x128xf32, #tpu.memory_space<vmem>>, vector<1x128xf32>
    %7 = vector.broadcast %6 : vector<1x128xf32> to vector<512x128xf32>
    %8 = arith.addf %5, %7 : vector<512x128xf32>
    %c0_6 = arith.constant 0 : index
    %c0_7 = arith.constant 0 : index
    %9 = vector.load %arg7[%c0_6, %c0_7] : memref<1x128xf32, #tpu.memory_space<vmem>>, vector<1x128xf32>
    %cst_8 = arith.constant dense<0.000000e+00> : vector<128xf32>
    %10 = vector.multi_reduction <add>, %8, %cst_8 [0] : vector<512x128xf32> to vector<128xf32>
    %11 = vector.shape_cast %10 : vector<128xf32> to vector<1x128xf32>
    %12 = arith.addf %9, %11 : vector<1x128xf32>
    %c0_9 = arith.constant 0 : index
    %c0_10 = arith.constant 0 : index
    %13 = vector.load %arg7[%c0_9, %c0_10] : memref<1x128xf32, #tpu.memory_space<vmem>>, vector<1x128xf32>
    tpu.vector_store %arg7[%c0_9, %c0_10], %12 {strides = array<i32>} : memref<1x128xf32, #tpu.memory_space<vmem>>, vector<1x128xf32>,
    %c512_i32 = arith.constant 512 : i32
    %14 = arith.muli %arg0, %c512_i32 : i32
    %15 = tpu.assume_multiple %14, 512 : i32
    %16 = arith.index_cast %15 : i32 to index
    %c0_11 = arith.constant 0 : index
    %17 = vector.load %arg6[%16, %c0_11] : memref<1024x128xf32, #tpu.memory_space<vmem>>, vector<512x128xf32>
    tpu.vector_store %arg6[%16, %c0_11], %8 {strides = array<i32>} : memref<1024x128xf32, #tpu.memory_space<vmem>>, vector<512x128xf32>,
    %c1_i32 = arith.constant 1 : i32
    %18 = arith.cmpi eq, %arg0, %c1_i32 : i32
    %19 = arith.extui %18 : i1 to i32
    %c0_i32_12 = arith.constant 0 : i32
    %20 = arith.cmpi ne, %19, %c0_i32_12 : i32
    scf.if %20 {
      %c0_13 = arith.constant 0 : index
      %c0_14 = arith.constant 0 : index
      %21 = vector.load %arg7[%c0_13, %c0_14] : memref<1x128xf32, #tpu.memory_space<vmem>>, vector<1x128xf32>
      %cst_15 = arith.constant 9.765625E-4 : f32
      %22 = vector.broadcast %cst_15 : f32 to vector<1x128xf32>
      %23 = arith.mulf %21, %22 : vector<1x128xf32>
      %cst_16 = arith.constant 0.000000e+00 : f32
      %24 = vector.broadcast %cst_16 : f32 to vector<1x128xf32>
      %c0_i32_17 = arith.constant 0 : i32
      %c512_i32_18 = arith.constant 512 : i32
      %25 = arith.muli %c0_i32_17, %c512_i32_18 : i32
      %26 = tpu.assume_multiple %25, 512 : i32
      %27 = arith.index_cast %26 : i32 to index
      %c0_19 = arith.constant 0 : index
      %28 = vector.load %arg6[%27, %c0_19] : memref<1024x128xf32, #tpu.memory_space<vmem>>, vector<512x128xf32>
      %29 = vector.broadcast %23 : vector<1x128xf32> to vector<512x128xf32>
      %30 = arith.subf %28, %29 : vector<512x128xf32>
      %31 = arith.mulf %30, %30 : vector<512x128xf32>
      %cst_20 = arith.constant dense<0.000000e+00> : vector<128xf32>
      %32 = vector.multi_reduction <add>, %31, %cst_20 [0] : vector<512x128xf32> to vector<128xf32>
      %33 = vector.shape_cast %32 : vector<128xf32> to vector<1x128xf32>
      %34 = arith.addf %24, %33 : vector<1x128xf32>
      %c1_i32_21 = arith.constant 1 : i32
      %c512_i32_22 = arith.constant 512 : i32
      %35 = arith.muli %c1_i32_21, %c512_i32_22 : i32
      %36 = tpu.assume_multiple %35, 512 : i32
      %37 = arith.index_cast %36 : i32 to index
      %c0_23 = arith.constant 0 : index
      %38 = vector.load %arg6[%37, %c0_23] : memref<1024x128xf32, #tpu.memory_space<vmem>>, vector<512x128xf32>
      %39 = vector.broadcast %23 : vector<1x128xf32> to vector<512x128xf32>
      %40 = arith.subf %38, %39 : vector<512x128xf32>
      %41 = arith.mulf %40, %40 : vector<512x128xf32>
      %cst_24 = arith.constant dense<0.000000e+00> : vector<128xf32>
      %42 = vector.multi_reduction <add>, %41, %cst_24 [0] : vector<512x128xf32> to vector<128xf32>
      %43 = vector.shape_cast %42 : vector<128xf32> to vector<1x128xf32>
      %44 = arith.addf %34, %43 : vector<1x128xf32>
      %c2_i32 = arith.constant 2 : i32
      %cst_25 = arith.constant 9.765625E-4 : f32
      %45 = vector.broadcast %cst_25 : f32 to vector<1x128xf32>
      %46 = arith.mulf %44, %45 : vector<1x128xf32>
      %cst_26 = arith.constant 9.99999974E-6 : f32
      %47 = vector.broadcast %cst_26 : f32 to vector<1x128xf32>
      %48 = arith.addf %46, %47 : vector<1x128xf32>
      %49 = math.sqrt %48 : vector<1x128xf32>
      %cst_27 = arith.constant 1.000000e+00 : f32
      %50 = vector.broadcast %cst_27 : f32 to vector<1x128xf32>
      %51 = arith.divf %50, %49 : vector<1x128xf32>
      %c0_28 = arith.constant 0 : index
      %c0_29 = arith.constant 0 : index
      %52 = vector.load %arg4[%c0_28, %c0_29] : memref<1x128xf32, #tpu.memory_space<vmem>>, vector<1x128xf32>
      %53 = arith.mulf %52, %51 : vector<1x128xf32>
      %c0_30 = arith.constant 0 : index
      %c0_31 = arith.constant 0 : index
      %54 = vector.load %arg5[%c0_30, %c0_31] : memref<1x128xf32, #tpu.memory_space<vmem>>, vector<1x128xf32>
      %55 = arith.mulf %23, %53 : vector<1x128xf32>
      %56 = arith.subf %54, %55 : vector<1x128xf32>
      %c0_i32_32 = arith.constant 0 : i32
      %c512_i32_33 = arith.constant 512 : i32
      %57 = arith.muli %c0_i32_32, %c512_i32_33 : i32
      %58 = tpu.assume_multiple %57, 512 : i32
      %59 = arith.index_cast %58 : i32 to index
      %c0_34 = arith.constant 0 : index
      %60 = vector.load %arg6[%59, %c0_34] : memref<1024x128xf32, #tpu.memory_space<vmem>>, vector<512x128xf32>
      %61 = vector.broadcast %53 : vector<1x128xf32> to vector<512x128xf32>
      %62 = arith.mulf %60, %61 : vector<512x128xf32>
      %63 = vector.broadcast %56 : vector<1x128xf32> to vector<512x128xf32>
      %64 = arith.addf %62, %63 : vector<512x128xf32>
      %cst_35 = arith.constant 0.000000e+00 : f32
      %65 = vector.broadcast %cst_35 : f32 to vector<512x128xf32>
      %66 = arith.maximumf %64, %65 : vector<512x128xf32>
      %67 = arith.index_cast %58 : i32 to index
      %c0_36 = arith.constant 0 : index
      %68 = vector.load %arg6[%67, %c0_36] : memref<1024x128xf32, #tpu.memory_space<vmem>>, vector<512x128xf32>
      tpu.vector_store %arg6[%67, %c0_36], %66 {strides = array<i32>} : memref<1024x128xf32, #tpu.memory_space<vmem>>, vector<512x128xf32>,
      %c1_i32_37 = arith.constant 1 : i32
      %c512_i32_38 = arith.constant 512 : i32
      %69 = arith.muli %c1_i32_37, %c512_i32_38 : i32
      %70 = tpu.assume_multiple %69, 512 : i32
      %71 = arith.index_cast %70 : i32 to index
      %c0_39 = arith.constant 0 : index
      %72 = vector.load %arg6[%71, %c0_39] : memref<1024x128xf32, #tpu.memory_space<vmem>>, vector<512x128xf32>
      %73 = vector.broadcast %53 : vector<1x128xf32> to vector<512x128xf32>
      %74 = arith.mulf %72, %73 : vector<512x128xf32>
      %75 = vector.broadcast %56 : vector<1x128xf32> to vector<512x128xf32>
      %76 = arith.addf %74, %75 : vector<512x128xf32>
      %cst_40 = arith.constant 0.000000e+00 : f32
      %77 = vector.broadcast %cst_40 : f32 to vector<512x128xf32>
      %78 = arith.maximumf %76, %77 : vector<512x128xf32>
      %79 = arith.index_cast %70 : i32 to index
      %c0_41 = arith.constant 0 : index
      %80 = vector.load %arg6[%79, %c0_41] : memref<1024x128xf32, #tpu.memory_space<vmem>>, vector<512x128xf32>
      tpu.vector_store %arg6[%79, %c0_41], %78 {strides = array<i32>} : memref<1024x128xf32, #tpu.memory_space<vmem>>, vector<512x128xf32>,
      %c2_i32_42 = arith.constant 2 : i32
    } else {
    }
    return
  }
  func.func @transform_0(%arg0: i32) -> (i32, i32) {
    %c0_i32 = arith.constant 0 : i32
    %c0_i32_0 = arith.constant 0 : i32
    return %arg0, %c0_i32 : i32, i32
  }
  func.func @transform_1(%arg0: i32) -> (i32, i32) {
    %c0_i32 = arith.constant 0 : i32
    %c0_i32_0 = arith.constant 0 : i32
    %c0_i32_1 = arith.constant 0 : i32
    return %c0_i32, %c0_i32_0 : i32, i32
  }
  func.func @transform_2(%arg0: i32) -> (i32, i32) {
    %c0_i32 = arith.constant 0 : i32
    %c0_i32_0 = arith.constant 0 : i32
    %c0_i32_1 = arith.constant 0 : i32
    return %c0_i32, %c0_i32_0 : i32, i32
  }
  func.func @transform_3(%arg0: i32) -> (i32, i32) {
    %c0_i32 = arith.constant 0 : i32
    %c0_i32_0 = arith.constant 0 : i32
    %c0_i32_1 = arith.constant 0 : i32
    return %c0_i32, %c0_i32_0 : i32, i32
  }
  func.func @transform_4(%arg0: i32) -> (i32, i32) {
    %c0_i32 = arith.constant 0 : i32
    %c0_i32_0 = arith.constant 0 : i32
    %c0_i32_1 = arith.constant 0 : i32
    return %c0_i32, %c0_i32_0 : i32, i32
  }
  func.func @transform_5(%arg0: i32) -> (i32, i32) {
    %c0_i32 = arith.constant 0 : i32
    %c0_i32_0 = arith.constant 0 : i32
    %c0_i32_1 = arith.constant 0 : i32
    return %c0_i32, %c0_i32_0 : i32, i32
  }
}

</mosaic_0001>

<bundles_post_ra>
// kernel: conv_block_forward.1
= control target key start
LH: loop header
LB: loop body
LE: loop exit
PB: predicated region body
PF: predicated region fallthrough
CT: control target
= control target key end

     0   :  { %s2539_s18 = smov 0   ;;  %s4511_s0 = inlined_call_operand.vmem [shape: f32[1024,128], index: 0, kind: input, shape index: {}]   ;;  %s4512_s1 = inlined_call_operand.vmem [shape: f32[128,128], index: 1, kind: input, shape index: {}]   ;;  %s4513_s2 = inlined_call_operand.vmem [shape: f32[1,128], index: 2, kind: input, shape index: {}]   ;;  %s4514_s3 = inlined_call_operand.vmem [shape: f32[1,128], index: 3, kind: input, shape index: {}]   ;;  %s4515_s4 = inlined_call_operand.vmem [shape: f32[1,128], index: 4, kind: input, shape index: {}]   ;;  %s4516_s5 = inlined_call_operand.vmem [shape: f32[1024,128], index: 5, kind: output, shape index: {}]  }
   0x1 LB: > { %s2545_s19 = sadd.s32 4294967295, %s2506_s18   ;;  %p2001_p0 = scmp.ge.s32.totalorder %s2506_s18, 1  ;;  %s2506_s18 = sphi %s2539_s18, %s15_s18  }
   0x2   : > { %p183_p1 = scmp.lt.s32.totalorder %s2506_s18, 3 }
   0x4   : > { %p184_p2 = pnand %p2001_p0, %p183_p1 }
   0x5   : > { %s2002_s20 = sshll.u32 (!%p184_p2), %s2545_s19, 6  ;;  %p2004_p4 = scmp.ne.s32.totalorder (!%p184_p2), %s2545_s19, 0 }
   0x6   : > { %187 = sbr.rel (%p184_p2) target bundleno = 734 (0x2de), region = 40  ;;  %p207_p3 = scmp.lt.s32.totalorder (!%p184_p2), %s2002_s20, 127 }
   0xd   : > { %s4524_s20 = smov (!%p207_p3, %s2002_s20), 127  ;;  %215 = sbr.rel (%p2004_p4) target bundleno = 20 (0x14), region = 44 }
   0xe   : > { %s2003_s21 = sshll.u32 %s4524_s20, 3  ;;  %v2508_v0 = vmov (!%p2004_p4), 0.0  }
   0xf   : > { %s2553_s24 = scalar_lea.vmem %s4511_s0, %s2003_s21  ;;  %216 = vst [vmem:[#allocation2] sm:$0x1] (!%p2004_p4), %v2508_v0 }
  0x14 PF: > { %v281_v1 = vld [vmem:[%s4512_s1] sm:$0xff]  ;;  %v282_v2 = vld [vmem:[%s4512_s1 + $0x8] sm:$0xff]  ;;  %v283_v3 = vld [vmem:[%s4512_s1 + $0x10] sm:$0xff]  ;;  %s2006_s10 = sshll.u32 %s2545_s19, 9  ;;  %p2007_p5 = scmp.ne.s32.totalorder %s2545_s19, 1 }
  0x15   : > { %v2410_v4 = vpack.c.bf16 %v282_v2, %v281_v1  ;;  %v284_v5 = vld [vmem:[%s4512_s1 + $0x18] sm:$0xff]  ;;  %v285_v7 = vld [vmem:[%s4512_s1 + $0x20] sm:$0xff]  ;;  %v286_v8 = vld [vmem:[%s4512_s1 + $0x28] sm:$0xff]  ;;  %s2677_s15 = scalar_lea.vmem %s4516_s5, %s2006_s10 }
  0x16   : > { %v2414_v6 = vpack.c.bf16 %v284_v5, %v283_v3  ;;  %v2418_v9 = vpack.c.bf16 %v286_v8, %v285_v7  ;;  %v217_v10 = vld [vmem:[%s2553_s24] sm:$0xff]  ;;  %v287_v11 = vld [vmem:[%s4512_s1 + $0x30] sm:$0xff]  ;;  %v288_v12 = vld [vmem:[%s4512_s1 + $0x38] sm:$0xff] }
  0x17   : > { %2411 = vmatprep.subr.bf16.mxu0 %v2410_v4  ;;  %2442 = vmatprep.subr.bf16.mxu1 %v2410_v4  ;;  %v2422_v13 = vpack.c.bf16 %v288_v12, %v287_v11  ;;  %v289_v14 = vld [vmem:[%s4512_s1 + $0x40] sm:$0xff]  ;;  %v290_v15 = vld [vmem:[%s4512_s1 + $0x48] sm:$0xff]  ;;  %v291_v17 = vld [vmem:[%s4512_s1 + $0x50] sm:$0xff] }
  0x18   : > { %2413 = vmatpush3.bf16.msra.mxu0 %v2410_v4  ;;  %2450 = vmatpush3.bf16.msra.mxu1 %v2410_v4  ;;  %v2426_v16 = vpack.c.bf16 %v290_v15, %v289_v14  ;;  %v292_v18 = vld [vmem:[%s4512_s1 + $0x58] sm:$0xff]  ;;  %v249_v19 = vld [vmem:[%s2553_s24 + $0x100] sm:$0xff]  ;;  %v294_v22 = vld [vmem:[%s4512_s1 + $0x68] sm:$0xff] }
  0x19   : > { %2415 = vmatprep.subr.bf16.mxu0 %v2414_v6  ;;  %2443 = vmatprep.subr.bf16.mxu1 %v2414_v6  ;;  %v2430_v20 = vpack.c.bf16 %v292_v18, %v291_v17  ;;  %v293_v21 = vld [vmem:[%s4512_s1 + $0x60] sm:$0xff]  ;;  %v295_v24 = vld [vmem:[%s4512_s1 + $0x70] sm:$0xff]  ;;  %v296_v25 = vld [vmem:[%s4512_s1 + $0x78] sm:$0xff] }
  0x1a   : > { %2314 = vmatprep.mubr.f32.mxu0 %v217_v10  ;;  %2362 = vmatprep.mubr.f32.mxu1 %v249_v19  ;;  %v2434_v23 = vpack.c.bf16 %v294_v22, %v293_v21  ;;  %v2438_v26 = vpack.c.bf16 %v296_v25, %v295_v24  ;;  %v218_v27 = vld [vmem:[%s2553_s24 + $0x8] sm:$0xff]  ;;  %v219_v29 = vld [vmem:[%s2553_s24 + $0x10] sm:$0xff]  ;;  %v220_v31 = vld [vmem:[%s2553_s24 + $0x18] sm:$0xff] }
  0x1b   : > { %v250_v28 = vld [vmem:[%s2553_s24 + $0x108] sm:$0xff]  ;;  %v251_v30 = vld [vmem:[%s2553_s24 + $0x110] sm:$0xff]  ;;  %v252_v32 = vld [vmem:[%s2553_s24 + $0x118] sm:$0xff] }
  0x1c   : > { %2417 = vmatpush3.bf16.msra.mxu0 %v2414_v6  ;;  %2451 = vmatpush3.bf16.msra.mxu1 %v2414_v6  ;;  %v221_v33 = vld [vmem:[%s2553_s24 + $0x20] sm:$0xff]  ;;  %v222_v35 = vld [vmem:[%s2553_s24 + $0x28] sm:$0xff]  ;;  %v223_v37 = vld [vmem:[%s2553_s24 + $0x30] sm:$0xff] }
  0x1d   : > { %2419 = vmatprep.subr.bf16.mxu0 %v2418_v9  ;;  %2444 = vmatprep.subr.bf16.mxu1 %v2418_v9  ;;  %v253_v34 = vld [vmem:[%s2553_s24 + $0x120] sm:$0xff]  ;;  %v254_v36 = vld [vmem:[%s2553_s24 + $0x128] sm:$0xff]  ;;  %v255_v38 = vld [vmem:[%s2553_s24 + $0x130] sm:$0xff] }
  0x1e   : > { %v224_v39 = vld [vmem:[%s2553_s24 + $0x38] sm:$0xff]  ;;  %v225_v41 = vld [vmem:[%s2553_s24 + $0x40] sm:$0xff]  ;;  %v226_v43 = vld [vmem:[%s2553_s24 + $0x48] sm:$0xff] }
  0x1f   : > { %v256_v40 = vld [vmem:[%s2553_s24 + $0x138] sm:$0xff]  ;;  %v257_v42 = vld [vmem:[%s2553_s24 + $0x140] sm:$0xff]  ;;  %v258_v44 = vld [vmem:[%s2553_s24 + $0x148] sm:$0xff] }
  0x20   : > { %2421 = vmatpush3.bf16.msra.mxu0 %v2418_v9  ;;  %2452 = vmatpush3.bf16.msra.mxu1 %v2418_v9  ;;  %v227_v45 = vld [vmem:[%s2553_s24 + $0x50] sm:$0xff]  ;;  %v228_v47 = vld [vmem:[%s2553_s24 + $0x58] sm:$0xff]  ;;  %v229_v49 = vld [vmem:[%s2553_s24 + $0x60] sm:$0xff] }
  0x21   : > { %2423 = vmatprep.subr.bf16.mxu0 %v2422_v13  ;;  %2445 = vmatprep.subr.bf16.mxu1 %v2422_v13  ;;  %v259_v46 = vld [vmem:[%s2553_s24 + $0x150] sm:$0xff]  ;;  %v260_v48 = vld [vmem:[%s2553_s24 + $0x158] sm:$0xff]  ;;  %v261_v50 = vld [vmem:[%s2553_s24 + $0x160] sm:$0xff] }
  0x22   : > { %v230_v51 = vld [vmem:[%s2553_s24 + $0x68] sm:$0xff]  ;;  %v231_v53 = vld [vmem:[%s2553_s24 + $0x70] sm:$0xff]  ;;  %v232_v55 = vld [vmem:[%s2553_s24 + $0x78] sm:$0xff] }
  0x23   : > { %v262_v52 = vld [vmem:[%s2553_s24 + $0x168] sm:$0xff]  ;;  %v263_v54 = vld [vmem:[%s2553_s24 + $0x170] sm:$0xff]  ;;  %v264_v56 = vld [vmem:[%s2553_s24 + $0x178] sm:$0xff] }
  0x24   : > { %2425 = vmatpush3.bf16.msra.mxu0 %v2422_v13  ;;  %2453 = vmatpush3.bf16.msra.mxu1 %v2422_v13  ;;  %v233_v57 = vld [vmem:[%s2553_s24 + $0x80] sm:$0xff]  ;;  %v234_v59 = vld [vmem:[%s2553_s24 + $0x88] sm:$0xff]  ;;  %v235_v61 = vld [vmem:[%s2553_s24 + $0x90] sm:$0xff] }
  0x25   : > { %2427 = vmatprep.subr.bf16.mxu0 %v2426_v16  ;;  %2446 = vmatprep.subr.bf16.mxu1 %v2426_v16  ;;  %v265_v58 = vld [vmem:[%s2553_s24 + $0x180] sm:$0xff]  ;;  %v266_v60 = vld [vmem:[%s2553_s24 + $0x188] sm:$0xff]  ;;  %v267_v62 = vld [vmem:[%s2553_s24 + $0x190] sm:$0xff] }
  0x26   : > { %v236_v63 = vld [vmem:[%s2553_s24 + $0x98] sm:$0xff]  ;;  %v237_v1 = vld [vmem:[%s2553_s24 + $0xa0] sm:$0xff]  ;;  %v238_v3 = vld [vmem:[%s2553_s24 + $0xa8] sm:$0xff] }
  0x27   : > { %v268_v0 = vld [vmem:[%s2553_s24 + $0x198] sm:$0xff]  ;;  %v269_v2 = vld [vmem:[%s2553_s24 + $0x1a0] sm:$0xff]  ;;  %v270_v4 = vld [vmem:[%s2553_s24 + $0x1a8] sm:$0xff] }
  0x28   : > { %2429 = vmatpush3.bf16.msra.mxu0 %v2426_v16  ;;  %2454 = vmatpush3.bf16.msra.mxu1 %v2426_v16  ;;  %v239_v5 = vld [vmem:[%s2553_s24 + $0xb0] sm:$0xff]  ;;  %v240_v7 = vld [vmem:[%s2553_s24 + $0xb8] sm:$0xff]  ;;  %v241_v9 = vld [vmem:[%s2553_s24 + $0xc0] sm:$0xff] }
  0x29   : > { %2431 = vmatprep.subr.bf16.mxu0 %v2430_v20  ;;  %2447 = vmatprep.subr.bf16.mxu1 %v2430_v20  ;;  %v271_v6 = vld [vmem:[%s2553_s24 + $0x1b0] sm:$0xff]  ;;  %v272_v8 = vld [vmem:[%s2553_s24 + $0x1b8] sm:$0xff]  ;;  %v273_v10 = vld [vmem:[%s2553_s24 + $0x1c0] sm:$0xff] }
  0x2a   : > { %v242_v11 = vld [vmem:[%s2553_s24 + $0xc8] sm:$0xff]  ;;  %v243_v13 = vld [vmem:[%s2553_s24 + $0xd0] sm:$0xff]  ;;  %v244_v15 = vld [vmem:[%s2553_s24 + $0xd8] sm:$0xff] }
  0x2b   : > { %v274_v12 = vld [vmem:[%s2553_s24 + $0x1c8] sm:$0xff]  ;;  %v275_v14 = vld [vmem:[%s2553_s24 + $0x1d0] sm:$0xff]  ;;  %v276_v16 = vld [vmem:[%s2553_s24 + $0x1d8] sm:$0xff] }
  0x2c   : > { %2433 = vmatpush3.bf16.msra.mxu0 %v2430_v20  ;;  %2455 = vmatpush3.bf16.msra.mxu1 %v2430_v20  ;;  %v245_v17 = vld [vmem:[%s2553_s24 + $0xe0] sm:$0xff]  ;;  %v246_v19 = vld [vmem:[%s2553_s24 + $0xe8] sm:$0xff]  ;;  %v247_v21 = vld [vmem:[%s2553_s24 + $0xf0] sm:$0xff] }
  0x2d   : > { %2435 = vmatprep.subr.bf16.mxu0 %v2434_v23  ;;  %2448 = vmatprep.subr.bf16.mxu1 %v2434_v23  ;;  %v277_v18 = vld [vmem:[%s2553_s24 + $0x1e0] sm:$0xff]  ;;  %v278_v20 = vld [vmem:[%s2553_s24 + $0x1e8] sm:$0xff]  ;;  %v279_v22 = vld [vmem:[%s2553_s24 + $0x1f0] sm:$0xff] }
  0x2e   : > { %v280_v24 = vld [vmem:[%s2553_s24 + $0x1f8] sm:$0xff]  ;;  %v2672_v25 = vld [vmem:[%s4513_s2] ss:$0 sm:$0xff] }
  0x30   : > { %2437 = vmatpush3.bf16.msra.mxu0 %v2434_v23  ;;  %2456 = vmatpush3.bf16.msra.mxu1 %v2434_v23  ;;  %v248_v23 = vld [vmem:[%s2553_s24 + $0xf8] sm:$0xff] }
  0x31   : > { %2439 = vmatprep.subr.bf16.mxu0 %v2438_v26  ;;  %2449 = vmatprep.subr.bf16.mxu1 %v2438_v26 }
  0x34   : > { %2441 = vmatpush3.bf16.msra.mxu0 %v2438_v26  ;;  %2457 = vmatpush3.bf16.msra.mxu1 %v2438_v26 }
  0x37   : > { %2315 = vmatmul.mubr.f32.vlgmr.msra.gmra.mrb[0].mxu0 %v218_v27  ;;  %2363 = vmatmul.mubr.f32.vlgmr.msra.gmra.mrb[0].mxu1 %v250_v28 }
  0x38   : > { %2317 = vmatprep.mubr.f32.mxu0 %v219_v29  ;;  %2365 = vmatprep.mubr.f32.mxu1 %v251_v30 }
  0x3b   : > { %2318 = vmatmul.mubr.f32.gmra.mrb[2].mxu0 %v220_v31  ;;  %2366 = vmatmul.mubr.f32.gmra.mrb[2].mxu1 %v252_v32 }
  0x3c   : > { %2320 = vmatprep.mubr.f32.mxu0 %v221_v33  ;;  %2368 = vmatprep.mubr.f32.mxu1 %v253_v34 }
  0x3f   : > { %2321 = vmatmul.mubr.f32.gmra.mrb[4].mxu0 %v222_v35  ;;  %2369 = vmatmul.mubr.f32.gmra.mrb[4].mxu1 %v254_v36 }
  0x40   : > { %2323 = vmatprep.mubr.f32.mxu0 %v223_v37  ;;  %2371 = vmatprep.mubr.f32.mxu1 %v255_v38 }
  0x43   : > { %2324 = vmatmul.mubr.f32.gmra.mrb[6].mxu0 %v224_v39  ;;  %2372 = vmatmul.mubr.f32.gmra.mrb[6].mxu1 %v256_v40 }
  0x44   : > { %2326 = vmatprep.mubr.f32.mxu0 %v225_v41  ;;  %2374 = vmatprep.mubr.f32.mxu1 %v257_v42 }
  0x47   : > { %2327 = vmatmul.mubr.f32.gmra.mrb[8].mxu0 %v226_v43  ;;  %2375 = vmatmul.mubr.f32.gmra.mrb[8].mxu1 %v258_v44 }
  0x48   : > { %2329 = vmatprep.mubr.f32.mxu0 %v227_v45  ;;  %2377 = vmatprep.mubr.f32.mxu1 %v259_v46 }
  0x4b   : > { %2330 = vmatmul.mubr.f32.gmra.mrb[10].mxu0 %v228_v47  ;;  %2378 = vmatmul.mubr.f32.gmra.mrb[10].mxu1 %v260_v48 }
  0x4c   : > { %2332 = vmatprep.mubr.f32.mxu0 %v229_v49  ;;  %2380 = vmatprep.mubr.f32.mxu1 %v261_v50 }
  0x4f   : > { %2333 = vmatmul.mubr.f32.gmra.mrb[12].mxu0 %v230_v51  ;;  %2381 = vmatmul.mubr.f32.gmra.mrb[12].mxu1 %v262_v52 }
  0x50   : > { %2335 = vmatprep.mubr.f32.mxu0 %v231_v53  ;;  %2383 = vmatprep.mubr.f32.mxu1 %v263_v54 }
  0x53   : > { %2336 = vmatmul.mubr.f32.gmra.mrb[14].mxu0 %v232_v55  ;;  %2384 = vmatmul.mubr.f32.gmra.mrb[14].mxu1 %v264_v56 }
  0x54   : > { %2338 = vmatprep.mubr.f32.mxu0 %v233_v57  ;;  %2386 = vmatprep.mubr.f32.mxu1 %v265_v58 }
  0x57   : > { %2339 = vmatmul.mubr.f32.gmra.mrb[16].mxu0 %v234_v59  ;;  %2387 = vmatmul.mubr.f32.gmra.mrb[16].mxu1 %v266_v60 }
  0x58   : > { %2341 = vmatprep.mubr.f32.mxu0 %v235_v61  ;;  %2389 = vmatprep.mubr.f32.mxu1 %v267_v62 }
  0x5b   : > { %2342 = vmatmul.mubr.f32.gmra.mrb[18].mxu0 %v236_v63  ;;  %2390 = vmatmul.mubr.f32.gmra.mrb[18].mxu1 %v268_v0 }
  0x5c   : > { %2344 = vmatprep.mubr.f32.mxu0 %v237_v1  ;;  %2392 = vmatprep.mubr.f32.mxu1 %v269_v2 }
  0x5f   : > { %2345 = vmatmul.mubr.f32.gmra.mrb[20].mxu0 %v238_v3  ;;  %2393 = vmatmul.mubr.f32.gmra.mrb[20].mxu1 %v270_v4 }
  0x60   : > { %2347 = vmatprep.mubr.f32.mxu0 %v239_v5  ;;  %2395 = vmatprep.mubr.f32.mxu1 %v271_v6 }
  0x63   : > { %2348 = vmatmul.mubr.f32.gmra.mrb[22].mxu0 %v240_v7  ;;  %2396 = vmatmul.mubr.f32.gmra.mrb[22].mxu1 %v272_v8 }
  0x64   : > { %2350 = vmatprep.mubr.f32.mxu0 %v241_v9  ;;  %2398 = vmatprep.mubr.f32.mxu1 %v273_v10 }
  0x67   : > { %2351 = vmatmul.mubr.f32.gmra.mrb[24].mxu0 %v242_v11  ;;  %2399 = vmatmul.mubr.f32.gmra.mrb[24].mxu1 %v274_v12 }
  0x68   : > { %2353 = vmatprep.mubr.f32.mxu0 %v243_v13  ;;  %2401 = vmatprep.mubr.f32.mxu1 %v275_v14 }
  0x6b   : > { %2354 = vmatmul.mubr.f32.gmra.mrb[26].mxu0 %v244_v15  ;;  %2402 = vmatmul.mubr.f32.gmra.mrb[26].mxu1 %v276_v16 }
  0x6c   : > { %2356 = vmatprep.mubr.f32.mxu0 %v245_v17  ;;  %2404 = vmatprep.mubr.f32.mxu1 %v277_v18 }
  0x6f   : > { %2357 = vmatmul.mubr.f32.gmra.mrb[28].mxu0 %v246_v19  ;;  %2405 = vmatmul.mubr.f32.gmra.mrb[28].mxu1 %v278_v20 }
  0x70   : > { %2359 = vmatprep.mubr.f32.mxu0 %v247_v21  ;;  %2407 = vmatprep.mubr.f32.mxu1 %v279_v22 }
  0x73   : > { %2360 = vmatmul.mubr.f32.gmra.mrb[30].mxu0 %v248_v23  ;;  %2408 = vmatmul.mubr.f32.gmra.mrb[30].mxu1 %v280_v24 }
 0x10a   : > { %v2316_v26 = vpop.f32.mrb[0].mxu0  ;;  %v2364_v27 = vpop.f32.mrb[0].mxu1 }
 0x10b   : > { %v376_v28 = vadd.f32 %v2316_v26, %v2672_v25  ;;  %v370_v29 = vpop.f32.mrb[1].mxu0  ;;  %v2681_v30 = vadd.f32 %v2364_v27, %v2672_v25  ;;  %v530_v31 = vpop.f32.mrb[1].mxu1 }
 0x10c   : > { %v371_v32 = vadd.f32 %v2672_v25, %v370_v29  ;;  %v2685_v33 = vadd.f32 %v2672_v25, %v530_v31 }
 0x10d   : > { %764 = vst [vmem:[%s2677_s15 + $0x8] sm:$0xff] %v376_v28  ;;  %796 = vst [vmem:[%s2677_s15 + $0x108] sm:$0xff] %v2681_v30 }
 0x10e   : > { %v690_v34 = vadd.f32 %v376_v28, %v371_v32  ;;  %763 = vst [vmem:[%s2677_s15] sm:$0xff] %v371_v32  ;;  %v2319_v35 = vpop.f32.mrb[2].mxu0  ;;  %795 = vst [vmem:[%s2677_s15 + $0x100] sm:$0xff] %v2685_v33  ;;  %v2367_v36 = vpop.f32.mrb[2].mxu1 }
 0x10f   : > { %v386_v37 = vadd.f32 %v2319_v35, %v2672_v25  ;;  %v380_v38 = vpop.f32.mrb[3].mxu0  ;;  %v2695_v39 = vadd.f32 %v2367_v36, %v2672_v25  ;;  %v540_v40 = vpop.f32.mrb[3].mxu1 }
 0x110   : > { %v381_v41 = vadd.f32 %v2672_v25, %v380_v38  ;;  %v2699_v42 = vadd.f32 %v2672_v25, %v540_v40 }
 0x111   : > { %766 = vst [vmem:[%s2677_s15 + $0x18] sm:$0xff] %v386_v37  ;;  %798 = vst [vmem:[%s2677_s15 + $0x118] sm:$0xff] %v2695_v39 }
 0x112   : > { %v691_v43 = vadd.f32 %v690_v34, %v381_v41  ;;  %765 = vst [vmem:[%s2677_s15 + $0x10] sm:$0xff] %v381_v41  ;;  %v2322_v44 = vpop.f32.mrb[4].mxu0  ;;  %797 = vst [vmem:[%s2677_s15 + $0x110] sm:$0xff] %v2699_v42  ;;  %v2370_v45 = vpop.f32.mrb[4].mxu1 }
 0x113   : > { %v396_v46 = vadd.f32 %v2322_v44, %v2672_v25  ;;  %v390_v47 = vpop.f32.mrb[5].mxu0  ;;  %v2709_v48 = vadd.f32 %v2370_v45, %v2672_v25  ;;  %v550_v49 = vpop.f32.mrb[5].mxu1 }
 0x114   : > { %v391_v50 = vadd.f32 %v2672_v25, %v390_v47  ;;  %v692_v51 = vadd.f32 %v691_v43, %v386_v37  ;;  %v2713_v52 = vadd.f32 %v2672_v25, %v550_v49 }
 0x115   : > { %768 = vst [vmem:[%s2677_s15 + $0x28] sm:$0xff] %v396_v46  ;;  %800 = vst [vmem:[%s2677_s15 + $0x128] sm:$0xff] %v2709_v48 }
 0x116   : > { %v693_v53 = vadd.f32 %v692_v51, %v391_v50  ;;  %767 = vst [vmem:[%s2677_s15 + $0x20] sm:$0xff] %v391_v50  ;;  %v2325_v54 = vpop.f32.mrb[6].mxu0  ;;  %799 = vst [vmem:[%s2677_s15 + $0x120] sm:$0xff] %v2713_v52  ;;  %v2373_v55 = vpop.f32.mrb[6].mxu1 }
 0x117   : > { %v406_v56 = vadd.f32 %v2325_v54, %v2672_v25  ;;  %v400_v57 = vpop.f32.mrb[7].mxu0  ;;  %v2723_v58 = vadd.f32 %v2373_v55, %v2672_v25  ;;  %v560_v59 = vpop.f32.mrb[7].mxu1 }
 0x118   : > { %v401_v60 = vadd.f32 %v2672_v25, %v400_v57  ;;  %v694_v61 = vadd.f32 %v693_v53, %v396_v46  ;;  %v2727_v62 = vadd.f32 %v2672_v25, %v560_v59 }
 0x119   : > { %770 = vst [vmem:[%s2677_s15 + $0x38] sm:$0xff] %v406_v56  ;;  %802 = vst [vmem:[%s2677_s15 + $0x138] sm:$0xff] %v2723_v58 }
 0x11a   : > { %v695_v63 = vadd.f32 %v694_v61, %v401_v60  ;;  %769 = vst [vmem:[%s2677_s15 + $0x30] sm:$0xff] %v401_v60  ;;  %v2328_v0 = vpop.f32.mrb[8].mxu0  ;;  %801 = vst [vmem:[%s2677_s15 + $0x130] sm:$0xff] %v2727_v62  ;;  %v2376_v1 = vpop.f32.mrb[8].mxu1 }
 0x11b   : > { %v416_v2 = vadd.f32 %v2328_v0, %v2672_v25  ;;  %v410_v3 = vpop.f32.mrb[9].mxu0  ;;  %v2737_v4 = vadd.f32 %v2376_v1, %v2672_v25  ;;  %v570_v5 = vpop.f32.mrb[9].mxu1 }
 0x11c   : > { %v411_v6 = vadd.f32 %v2672_v25, %v410_v3  ;;  %v696_v7 = vadd.f32 %v695_v63, %v406_v56  ;;  %v2741_v8 = vadd.f32 %v2672_v25, %v570_v5 }
 0x11d   : > { %772 = vst [vmem:[%s2677_s15 + $0x48] sm:$0xff] %v416_v2  ;;  %804 = vst [vmem:[%s2677_s15 + $0x148] sm:$0xff] %v2737_v4 }
 0x11e   : > { %v697_v9 = vadd.f32 %v696_v7, %v411_v6  ;;  %771 = vst [vmem:[%s2677_s15 + $0x40] sm:$0xff] %v411_v6  ;;  %v2331_v10 = vpop.f32.mrb[10].mxu0  ;;  %803 = vst [vmem:[%s2677_s15 + $0x140] sm:$0xff] %v2741_v8  ;;  %v2379_v11 = vpop.f32.mrb[10].mxu1 }
 0x11f   : > { %v426_v12 = vadd.f32 %v2331_v10, %v2672_v25  ;;  %v420_v13 = vpop.f32.mrb[11].mxu0  ;;  %v2751_v14 = vadd.f32 %v2379_v11, %v2672_v25  ;;  %v580_v15 = vpop.f32.mrb[11].mxu1 }
 0x120   : > { %v421_v16 = vadd.f32 %v2672_v25, %v420_v13  ;;  %v698_v17 = vadd.f32 %v697_v9, %v416_v2  ;;  %v2755_v18 = vadd.f32 %v2672_v25, %v580_v15 }
 0x121   : > { %774 = vst [vmem:[%s2677_s15 + $0x58] sm:$0xff] %v426_v12  ;;  %806 = vst [vmem:[%s2677_s15 + $0x158] sm:$0xff] %v2751_v14 }
 0x122   : > { %v699_v19 = vadd.f32 %v698_v17, %v421_v16  ;;  %773 = vst [vmem:[%s2677_s15 + $0x50] sm:$0xff] %v421_v16  ;;  %v2334_v20 = vpop.f32.mrb[12].mxu0  ;;  %805 = vst [vmem:[%s2677_s15 + $0x150] sm:$0xff] %v2755_v18  ;;  %v2382_v21 = vpop.f32.mrb[12].mxu1 }
 0x123   : > { %v436_v22 = vadd.f32 %v2334_v20, %v2672_v25  ;;  %v430_v23 = vpop.f32.mrb[13].mxu0  ;;  %v2765_v24 = vadd.f32 %v2382_v21, %v2672_v25  ;;  %v590_v26 = vpop.f32.mrb[13].mxu1 }
 0x124   : > { %v431_v27 = vadd.f32 %v2672_v25, %v430_v23  ;;  %v700_v28 = vadd.f32 %v699_v19, %v426_v12  ;;  %v2769_v29 = vadd.f32 %v2672_v25, %v590_v26 }
 0x125   : > { %776 = vst [vmem:[%s2677_s15 + $0x68] sm:$0xff] %v436_v22  ;;  %808 = vst [vmem:[%s2677_s15 + $0x168] sm:$0xff] %v2765_v24 }
 0x126   : > { %v701_v31 = vadd.f32 %v700_v28, %v431_v27  ;;  %775 = vst [vmem:[%s2677_s15 + $0x60] sm:$0xff] %v431_v27  ;;  %v2337_v32 = vpop.f32.mrb[14].mxu0  ;;  %807 = vst [vmem:[%s2677_s15 + $0x160] sm:$0xff] %v2769_v29  ;;  %v2385_v34 = vpop.f32.mrb[14].mxu1 }
 0x127   : > { %v446_v35 = vadd.f32 %v2337_v32, %v2672_v25  ;;  %v440_v36 = vpop.f32.mrb[15].mxu0  ;;  %v2779_v37 = vadd.f32 %v2385_v34, %v2672_v25  ;;  %v600_v38 = vpop.f32.mrb[15].mxu1 }
 0x128   : > { %v441_v40 = vadd.f32 %v2672_v25, %v440_v36  ;;  %v702_v41 = vadd.f32 %v701_v31, %v436_v22  ;;  %v2783_v43 = vadd.f32 %v2672_v25, %v600_v38 }
 0x129   : > { %778 = vst [vmem:[%s2677_s15 + $0x78] sm:$0xff] %v446_v35  ;;  %810 = vst [vmem:[%s2677_s15 + $0x178] sm:$0xff] %v2779_v37 }
 0x12a   : > { %v703_v44 = vadd.f32 %v702_v41, %v441_v40  ;;  %777 = vst [vmem:[%s2677_s15 + $0x70] sm:$0xff] %v441_v40  ;;  %v2340_v45 = vpop.f32.mrb[16].mxu0  ;;  %809 = vst [vmem:[%s2677_s15 + $0x170] sm:$0xff] %v2783_v43  ;;  %v2388_v46 = vpop.f32.mrb[16].mxu1 }
 0x12b   : > { %v456_v47 = vadd.f32 %v2340_v45, %v2672_v25  ;;  %v450_v49 = vpop.f32.mrb[17].mxu0  ;;  %v2793_v50 = vadd.f32 %v2388_v46, %v2672_v25  ;;  %v610_v51 = vpop.f32.mrb[17].mxu1 }
 0x12c   : > { %v451_v53 = vadd.f32 %v2672_v25, %v450_v49  ;;  %v704_v54 = vadd.f32 %v703_v44, %v446_v35  ;;  %v2797_v55 = vadd.f32 %v2672_v25, %v610_v51 }
 0x12d   : > { %780 = vst [vmem:[%s2677_s15 + $0x88] sm:$0xff] %v456_v47  ;;  %812 = vst [vmem:[%s2677_s15 + $0x188] sm:$0xff] %v2793_v50 }
 0x12e   : > { %v705_v56 = vadd.f32 %v704_v54, %v451_v53  ;;  %779 = vst [vmem:[%s2677_s15 + $0x80] sm:$0xff] %v451_v53  ;;  %v2343_v57 = vpop.f32.mrb[18].mxu0  ;;  %811 = vst [vmem:[%s2677_s15 + $0x180] sm:$0xff] %v2797_v55  ;;  %v2391_v59 = vpop.f32.mrb[18].mxu1 }
 0x12f   : > { %v466_v60 = vadd.f32 %v2343_v57, %v2672_v25  ;;  %v460_v61 = vpop.f32.mrb[19].mxu0  ;;  %v2807_v63 = vadd.f32 %v2391_v59, %v2672_v25  ;;  %v620_v0 = vpop.f32.mrb[19].mxu1 }
 0x130   : > { %v461_v1 = vadd.f32 %v2672_v25, %v460_v61  ;;  %v706_v2 = vadd.f32 %v705_v56, %v456_v47  ;;  %v2811_v3 = vadd.f32 %v2672_v25, %v620_v0 }
 0x131   : > { %782 = vst [vmem:[%s2677_s15 + $0x98] sm:$0xff] %v466_v60  ;;  %814 = vst [vmem:[%s2677_s15 + $0x198] sm:$0xff] %v2807_v63 }
 0x132   : > { %v707_v5 = vadd.f32 %v706_v2, %v461_v1  ;;  %781 = vst [vmem:[%s2677_s15 + $0x90] sm:$0xff] %v461_v1  ;;  %v2346_v6 = vpop.f32.mrb[20].mxu0  ;;  %813 = vst [vmem:[%s2677_s15 + $0x190] sm:$0xff] %v2811_v3  ;;  %v2394_v7 = vpop.f32.mrb[20].mxu1 }
 0x133   : > { %v476_v9 = vadd.f32 %v2346_v6, %v2672_v25  ;;  %v470_v10 = vpop.f32.mrb[21].mxu0  ;;  %v2821_v11 = vadd.f32 %v2394_v7, %v2672_v25  ;;  %v630_v12 = vpop.f32.mrb[21].mxu1 }
 0x134   : > { %v471_v13 = vadd.f32 %v2672_v25, %v470_v10  ;;  %v708_v15 = vadd.f32 %v707_v5, %v466_v60  ;;  %v2825_v16 = vadd.f32 %v2672_v25, %v630_v12 }
 0x135   : > { %784 = vst [vmem:[%s2677_s15 + $0xa8] sm:$0xff] %v476_v9  ;;  %816 = vst [vmem:[%s2677_s15 + $0x1a8] sm:$0xff] %v2821_v11 }
 0x136   : > { %v709_v17 = vadd.f32 %v708_v15, %v471_v13  ;;  %783 = vst [vmem:[%s2677_s15 + $0xa0] sm:$0xff] %v471_v13  ;;  %v2349_v19 = vpop.f32.mrb[22].mxu0  ;;  %815 = vst [vmem:[%s2677_s15 + $0x1a0] sm:$0xff] %v2825_v16  ;;  %v2397_v20 = vpop.f32.mrb[22].mxu1 }
 0x137   : > { %v486_v21 = vadd.f32 %v2349_v19, %v2672_v25  ;;  %v480_v22 = vpop.f32.mrb[23].mxu0  ;;  %v2835_v23 = vadd.f32 %v2397_v20, %v2672_v25  ;;  %v640_v26 = vpop.f32.mrb[23].mxu1 }
 0x138   : > { %v481_v27 = vadd.f32 %v2672_v25, %v480_v22  ;;  %v710_v28 = vadd.f32 %v709_v17, %v476_v9  ;;  %v2839_v31 = vadd.f32 %v2672_v25, %v640_v26 }
 0x139   : > { %786 = vst [vmem:[%s2677_s15 + $0xb8] sm:$0xff] %v486_v21  ;;  %818 = vst [vmem:[%s2677_s15 + $0x1b8] sm:$0xff] %v2835_v23 }
 0x13a   : > { %v711_v32 = vadd.f32 %v710_v28, %v481_v27  ;;  %785 = vst [vmem:[%s2677_s15 + $0xb0] sm:$0xff] %v481_v27  ;;  %v2352_v34 = vpop.f32.mrb[24].mxu0  ;;  %817 = vst [vmem:[%s2677_s15 + $0x1b0] sm:$0xff] %v2839_v31  ;;  %v2400_v35 = vpop.f32.mrb[24].mxu1 }
 0x13b   : > { %v496_v36 = vadd.f32 %v2352_v34, %v2672_v25  ;;  %v490_v38 = vpop.f32.mrb[25].mxu0  ;;  %v2849_v40 = vadd.f32 %v2400_v35, %v2672_v25  ;;  %v650_v41 = vpop.f32.mrb[25].mxu1 }
 0x13c   : > { %v491_v44 = vadd.f32 %v2672_v25, %v490_v38  ;;  %v712_v45 = vadd.f32 %v711_v32, %v486_v21  ;;  %v2853_v46 = vadd.f32 %v2672_v25, %v650_v41 }
 0x13d   : > { %788 = vst [vmem:[%s2677_s15 + $0xc8] sm:$0xff] %v496_v36  ;;  %820 = vst [vmem:[%s2677_s15 + $0x1c8] sm:$0xff] %v2849_v40 }
 0x13e   : > { %v713_v47 = vadd.f32 %v712_v45, %v491_v44  ;;  %787 = vst [vmem:[%s2677_s15 + $0xc0] sm:$0xff] %v491_v44  ;;  %v2355_v49 = vpop.f32.mrb[26].mxu0  ;;  %819 = vst [vmem:[%s2677_s15 + $0x1c0] sm:$0xff] %v2853_v46  ;;  %v2403_v51 = vpop.f32.mrb[26].mxu1 }
 0x13f   : > { %v506_v53 = vadd.f32 %v2355_v49, %v2672_v25  ;;  %v500_v54 = vpop.f32.mrb[27].mxu0  ;;  %v2863_v56 = vadd.f32 %v2403_v51, %v2672_v25  ;;  %v660_v57 = vpop.f32.mrb[27].mxu1 }
 0x140   : > { %v501_v59 = vadd.f32 %v2672_v25, %v500_v54  ;;  %v714_v60 = vadd.f32 %v713_v47, %v496_v36  ;;  %v661_v61 = vadd.f32 %v2672_v25, %v660_v57 }
 0x141   : > { %790 = vst [vmem:[%s2677_s15 + $0xd8] sm:$0xff] %v506_v53  ;;  %822 = vst [vmem:[%s2677_s15 + $0x1d8] sm:$0xff] %v2863_v56 }
 0x142   : > { %v715_v0 = vadd.f32 %v714_v60, %v501_v59  ;;  %789 = vst [vmem:[%s2677_s15 + $0xd0] sm:$0xff] %v501_v59  ;;  %v2358_v1 = vpop.f32.mrb[28].mxu0  ;;  %821 = vst [vmem:[%s2677_s15 + $0x1d0] sm:$0xff] %v661_v61  ;;  %v2406_v2 = vpop.f32.mrb[28].mxu1 }
 0x143   : > { %v516_v5 = vadd.f32 %v2358_v1, %v2672_v25  ;;  %v510_v6 = vpop.f32.mrb[29].mxu0  ;;  %v676_v7 = vadd.f32 %v2406_v2, %v2672_v25  ;;  %v670_v9 = vpop.f32.mrb[29].mxu1  ;;  %v689_v1 = vld [vmem:[#allocation2] sm:$0x1] }
 0x144   : > { %v511_v10 = vadd.f32 %v2672_v25, %v510_v6  ;;  %v716_v12 = vadd.f32 %v715_v0, %v506_v53  ;;  %v671_v13 = vadd.f32 %v2672_v25, %v670_v9 }
 0x145   : > { %792 = vst [vmem:[%s2677_s15 + $0xe8] sm:$0xff] %v516_v5  ;;  %824 = vst [vmem:[%s2677_s15 + $0x1e8] sm:$0xff] %v676_v7 }
 0x146   : > { %v717_v15 = vadd.f32 %v716_v12, %v511_v10  ;;  %791 = vst [vmem:[%s2677_s15 + $0xe0] sm:$0xff] %v511_v10  ;;  %v2361_v17 = vpop.f32.mrb[30].mxu0  ;;  %823 = vst [vmem:[%s2677_s15 + $0x1e0] sm:$0xff] %v671_v13  ;;  %v2409_v19 = vpop.f32.mrb[30].mxu1 }
 0x147   : > { %v526_v20 = vadd.f32 %v2361_v17, %v2672_v25  ;;  %v520_v21 = vpop.f32.mrb[31].mxu0  ;;  %v686_v22 = vadd.f32 %v2409_v19, %v2672_v25  ;;  %v680_v26 = vpop.f32.mrb[31].mxu1 }
 0x148   : > { %v521_v27 = vadd.f32 %v2672_v25, %v520_v21  ;;  %v718_v28 = vadd.f32 %v717_v15, %v516_v5  ;;  %v681_v32 = vadd.f32 %v2672_v25, %v680_v26 }
 0x149   : > { %794 = vst [vmem:[%s2677_s15 + $0xf8] sm:$0xff] %v526_v20  ;;  %826 = vst [vmem:[%s2677_s15 + $0x1f8] sm:$0xff] %v686_v22 }
 0x14a   : > { %v719_v34 = vadd.f32 %v718_v28, %v521_v27  ;;  %793 = vst [vmem:[%s2677_s15 + $0xf0] sm:$0xff] %v521_v27  ;;  %825 = vst [vmem:[%s2677_s15 + $0x1f0] sm:$0xff] %v681_v32 }
 0x14c   : > { %v720_v35 = vadd.f32 %v719_v34, %v526_v20 }
 0x14e   : > { %v721_v36 = vadd.f32 %v720_v35, %v2685_v33 }
 0x150   : > { %v722_v38 = vadd.f32 %v721_v36, %v2681_v30 }
 0x152   : > { %v723_v41 = vadd.f32 %v722_v38, %v2699_v42 }
 0x154   : > { %v724_v44 = vadd.f32 %v723_v41, %v2695_v39 }
 0x156   : > { %v725_v45 = vadd.f32 %v724_v44, %v2713_v52 }
 0x158   : > { %v726_v47 = vadd.f32 %v725_v45, %v2709_v48 }
 0x15a   : > { %v727_v25 = vadd.f32 %v726_v47, %v2727_v62 }
 0x15c   : > { %v728_v49 = vadd.f32 %v727_v25, %v2723_v58 }
 0x15e   : > { %v729_v51 = vadd.f32 %v728_v49, %v2741_v8 }
 0x160   : > { %v730_v53 = vadd.f32 %v729_v51, %v2737_v4 }
 0x162   : > { %v731_v33 = vadd.f32 %v730_v53, %v2755_v18 }
 0x164   : > { %v732_v30 = vadd.f32 %v731_v33, %v2751_v14 }
 0x166   : > { %v733_v42 = vadd.f32 %v732_v30, %v2769_v29 }
 0x168   : > { %v734_v39 = vadd.f32 %v733_v42, %v2765_v24 }
 0x16a   : > { %v735_v52 = vadd.f32 %v734_v39, %v2783_v43 }
 0x16c   : > { %v736_v48 = vadd.f32 %v735_v52, %v2779_v37 }
 0x16e   : > { %v737_v62 = vadd.f32 %v736_v48, %v2797_v55 }
 0x170   : > { %v738_v58 = vadd.f32 %v737_v62, %v2793_v50 }
 0x172   : > { %v739_v8 = vadd.f32 %v738_v58, %v2811_v3 }
 0x174   : > { %v740_v4 = vadd.f32 %v739_v8, %v2807_v63 }
 0x176   : > { %v741_v18 = vadd.f32 %v740_v4, %v2825_v16 }
 0x178   : > { %v742_v14 = vadd.f32 %v741_v18, %v2821_v11 }
 0x17a   : > { %v743_v29 = vadd.f32 %v742_v14, %v2839_v31 }
 0x17c   : > { %v744_v24 = vadd.f32 %v743_v29, %v2835_v23 }
 0x17e   : > { %v745_v43 = vadd.f32 %v744_v24, %v2853_v46 }
 0x180   : > { %v746_v37 = vadd.f32 %v745_v43, %v2849_v40 }
 0x182   : > { %v747_v54 = vadd.f32 %v746_v37, %v661_v61 }
 0x184   : > { %v748_v55 = vadd.f32 %v747_v54, %v2863_v56 }
 0x186   : > { %v749_v50 = vadd.f32 %v748_v55, %v671_v13 }
 0x188   : > { %v750_v57 = vadd.f32 %v749_v50, %v676_v7 }
 0x18a   : > { %v751_v3 = vadd.f32 %v750_v57, %v681_v32 }
 0x18c   : > { %v752_v59 = vadd.f32 %v751_v3, %v686_v22 }
 0x18e   : > { %v753_v63 = vrot.slane %v752_v59, 4 }
 0x190   : > { %v754_v60 = vadd.f32 %v753_v63, %v752_v59 }
 0x192   : > { %v755_v16 = vrot.slane %v754_v60, 2 }
 0x194   : > { %v756_v0 = vadd.f32 %v755_v16, %v754_v60 }
 0x196   : > { %v757_v11 = vrot.slane %v756_v0, 1  ;;  %830 = sbr.rel (%p2007_p5) target bundleno = 734 (0x2de), region = 48 }
 0x198   : > { %v758_v31 = vadd.f32 %v757_v11, %v756_v0 }
 0x19a   : > { %v759_v2 = vadd.f32 %v758_v31, %v689_v1 }
 0x19c   : > { %760 = vst [vmem:[#allocation2] sm:$0x1] %v759_v2 }
 0x19d   : > { %v898_v23 = vlaneseq  ;;  %v833_v6 = vld [vmem:[%s4516_s5] sm:$0xff]  ;;  %v834_v7 = vld [vmem:[%s4516_s5 + $0x8] sm:$0xff]  ;;  %v835_v9 = vld [vmem:[%s4516_s5 + $0x10] sm:$0xff] }
 0x19e   : > { %v836_v13 = vld [vmem:[%s4516_s5 + $0x18] sm:$0xff]  ;;  %v837_v17 = vld [vmem:[%s4516_s5 + $0x20] sm:$0xff]  ;;  %v838_v22 = vld [vmem:[%s4516_s5 + $0x28] sm:$0xff] }
 0x19f   : > { %v899_v40 = vshrl.u32 %v898_v23, 7  ;;  %v839_v28 = vld [vmem:[%s4516_s5 + $0x30] sm:$0xff]  ;;  %v840_v36 = vld [vmem:[%s4516_s5 + $0x38] sm:$0xff]  ;;  %v841_v45 = vld [vmem:[%s4516_s5 + $0x40] sm:$0xff] }
 0x1a0   : > { %v842_v51 = vld [vmem:[%s4516_s5 + $0x48] sm:$0xff]  ;;  %v843_v42 = vld [vmem:[%s4516_s5 + $0x50] sm:$0xff]  ;;  %v844_v62 = vld [vmem:[%s4516_s5 + $0x58] sm:$0xff] }
 0x1a1   : > { %v2918_v61 = vsub.s32 0, %v899_v40  ;;  %v845_v18 = vld [vmem:[%s4516_s5 + $0x60] sm:$0xff]  ;;  %v846_v43 = vld [vmem:[%s4516_s5 + $0x68] sm:$0xff]  ;;  %v847_v50 = vld [vmem:[%s4516_s5 + $0x70] sm:$0xff] }
 0x1a2   : > { %v848_v63 = vld [vmem:[%s4516_s5 + $0x78] sm:$0xff]  ;;  %v849_v11 = vld [vmem:[%s4516_s5 + $0x80] sm:$0xff]  ;;  %v850_v23 = vld [vmem:[%s4516_s5 + $0x88] sm:$0xff] }
 0x1a3   : > { %v831_v46 = vld [vmem:[#allocation2] sm:$0x1] }
 0x1a4   : > { %v2916_v56 = vmul.f32 0.0009765625, %v831_v46 }
 0x1a6   : > { %v2922_v5 = vrot.slane %v2916_v56, %v2918_v61 }
 0x1a8   : > { %v903_v10 = vsub.f32 %v833_v6, %v2922_v5  ;;  %v904_v12 = vsub.f32 %v834_v7, %v2922_v5  ;;  %v905_v15 = vsub.f32 %v835_v9, %v2922_v5  ;;  %v906_v19 = vsub.f32 %v836_v13, %v2922_v5  ;;  %v851_v7 = vld [vmem:[%s4516_s5 + $0x90] sm:$0xff]  ;;  %v852_v9 = vld [vmem:[%s4516_s5 + $0x98] sm:$0xff] }
 0x1a9   : > { %v907_v26 = vsub.f32 %v837_v17, %v2922_v5  ;;  %v908_v32 = vsub.f32 %v838_v22, %v2922_v5  ;;  %v909_v38 = vsub.f32 %v839_v28, %v2922_v5  ;;  %v910_v47 = vsub.f32 %v840_v36, %v2922_v5  ;;  %v2009_v17 = vld [vmem:[%s4516_s5 + $0x208] sm:$0xff]  ;;  %v853_v22 = vld [vmem:[%s4516_s5 + $0xa0] sm:$0xff] }
 0x1aa   : > { %v967_v20 = vmul.f32 %v903_v10, %v903_v10  ;;  %v968_v21 = vmul.f32 %v904_v12, %v904_v12  ;;  %v969_v27 = vmul.f32 %v905_v15, %v905_v15  ;;  %v970_v34 = vmul.f32 %v906_v19, %v906_v19  ;;  %v2008_v15 = vld [vmem:[%s4516_s5 + $0x200] sm:$0xff]  ;;  %v854_v28 = vld [vmem:[%s4516_s5 + $0xa8] sm:$0xff] }
 0x1ab   : > { %v971_v41 = vmul.f32 %v907_v26, %v907_v26  ;;  %v972_v25 = vmul.f32 %v908_v32, %v908_v32  ;;  %v911_v53 = vsub.f32 %v841_v45, %v2922_v5  ;;  %v973_v33 = vmul.f32 %v909_v38, %v909_v38  ;;  %v2011_v38 = vld [vmem:[%s4516_s5 + $0x218] sm:$0xff] }
 0x1ac   : > { %v1031_v35 = vadd.f32 %v968_v21, %v967_v20  ;;  %v912_v39 = vsub.f32 %v842_v51, %v2922_v5  ;;  %v974_v52 = vmul.f32 %v910_v47, %v910_v47  ;;  %v913_v58 = vsub.f32 %v843_v42, %v2922_v5 }
 0x1ad   : > { %v975_v8 = vmul.f32 %v911_v53, %v911_v53  ;;  %v914_v14 = vsub.f32 %v844_v62, %v2922_v5  ;;  %v915_v37 = vsub.f32 %v845_v18, %v2922_v5  ;;  %v916_v57 = vsub.f32 %v846_v43, %v2922_v5  ;;  %v2012_v53 = vld [vmem:[%s4516_s5 + $0x220] sm:$0xff]  ;;  %v2013_v62 = vld [vmem:[%s4516_s5 + $0x228] sm:$0xff]  ;;  %v2014_v43 = vld [vmem:[%s4516_s5 + $0x230] sm:$0xff] }
 0x1ae   : > { %v1032_v44 = vadd.f32 %v1031_v35, %v969_v27  ;;  %v976_v29 = vmul.f32 %v912_v39, %v912_v39  ;;  %v977_v54 = vmul.f32 %v913_v58, %v913_v58  ;;  %v917_v60 = vsub.f32 %v847_v50, %v2922_v5  ;;  %v2010_v27 = vld [vmem:[%s4516_s5 + $0x210] sm:$0xff]  ;;  %v857_v58 = vld [vmem:[%s4516_s5 + $0xc0] sm:$0xff] }
 0x1af   : > { %v978_v3 = vmul.f32 %v914_v14, %v914_v14  ;;  %v979_v16 = vmul.f32 %v915_v37, %v915_v37  ;;  %v918_v1 = vsub.f32 %v848_v63, %v2922_v5  ;;  %v980_v31 = vmul.f32 %v916_v57, %v916_v57  ;;  %v858_v37 = vld [vmem:[%s4516_s5 + $0xc8] sm:$0xff]  ;;  %v2015_v63 = vld [vmem:[%s4516_s5 + $0x238] sm:$0xff] }
 0x1b0   : > { %v1033_v49 = vadd.f32 %v1032_v44, %v970_v34  ;;  %v919_v40 = vsub.f32 %v849_v11, %v2922_v5  ;;  %v981_v46 = vmul.f32 %v917_v60, %v917_v60  ;;  %v920_v10 = vsub.f32 %v850_v23, %v2922_v5  ;;  %v859_v60 = vld [vmem:[%s4516_s5 + $0xd0] sm:$0xff]  ;;  %v2016_v23 = vld [vmem:[%s4516_s5 + $0x240] sm:$0xff] }
 0x1b1   : > { %v982_v12 = vmul.f32 %v918_v1, %v918_v1  ;;  %v921_v19 = vsub.f32 %v851_v7, %v2922_v5  ;;  %v922_v26 = vsub.f32 %v852_v9, %v2922_v5  ;;  %v1166_v35 = vsub.f32 %v2008_v15, %v2922_v5  ;;  %v861_v15 = vld [vmem:[%s4516_s5 + $0xe0] sm:$0xff] }
 0x1b2   : > { %v1034_v30 = vadd.f32 %v1033_v49, %v971_v41  ;;  %v983_v20 = vmul.f32 %v919_v40, %v919_v40  ;;  %v984_v32 = vmul.f32 %v920_v10, %v920_v10  ;;  %v1167_v36 = vsub.f32 %v2009_v17, %v2922_v5  ;;  %v855_v41 = vld [vmem:[%s4516_s5 + $0xb0] sm:$0xff]  ;;  %v860_v40 = vld [vmem:[%s4516_s5 + $0xd8] sm:$0xff] }
 0x1b3   : > { %v923_v44 = vsub.f32 %v853_v22, %v2922_v5  ;;  %v985_v45 = vmul.f32 %v921_v19, %v921_v19  ;;  %v924_v49 = vsub.f32 %v854_v28, %v2922_v5  ;;  %v986_v51 = vmul.f32 %v922_v26, %v922_v26  ;;  %v3084_v28 = vld [vmem:[%s4516_s5 + $0xe8] sm:$0xff] }
 0x1b4   : > { %v1035_v48 = vadd.f32 %v1034_v30, %v972_v25  ;;  %v1168_v25 = vsub.f32 %v2010_v27, %v2922_v5  ;;  %v1169_v42 = vsub.f32 %v2011_v38, %v2922_v5  ;;  %v1230_v39 = vmul.f32 %v1166_v35, %v1166_v35  ;;  %v2018_v27 = vld [vmem:[%s4516_s5 + $0x250] sm:$0xff] }
 0x1b5   : > { %v1170_v18 = vsub.f32 %v2012_v53, %v2922_v5  ;;  %v929_v10 = vsub.f32 %v859_v60, %v2922_v5  ;;  %v1174_v19 = vsub.f32 %v2016_v23, %v2922_v5  ;;  %v930_v22 = vsub.f32 %v860_v40, %v2922_v5 }
 0x1b6   : > { %v1036_v4 = vadd.f32 %v1035_v48, %v973_v33  ;;  %v856_v33 = vld [vmem:[%s4516_s5 + $0xb8] sm:$0xff]  ;;  %v925_v48 = vsub.f32 %v855_v41, %v2922_v5  ;;  %v1232_v14 = vmul.f32 %v1168_v25, %v1168_v25  ;;  %v1233_v50 = vmul.f32 %v1169_v42, %v1169_v42 }
 0x1b7   : > { %v1234_v11 = vmul.f32 %v1170_v18, %v1170_v18  ;;  %v931_v38 = vsub.f32 %v861_v15, %v2922_v5  ;;  %v993_v41 = vmul.f32 %v929_v10, %v929_v10  ;;  %v1176_v25 = vsub.f32 %v2018_v27, %v2922_v5  ;;  %v3105_v42 = vld [vmem:[%s4516_s5 + $0xf8] sm:$0xff]  ;;  %v3116_v18 = vld [vmem:[%s4516_s5 + $0x100] sm:$0xff] }
 0x1b8   : > { %v1037_v24 = vadd.f32 %v1036_v4, %v974_v52  ;;  %v1231_v52 = vmul.f32 %v1167_v36, %v1167_v36  ;;  %v932_v53 = vsub.f32 %v3084_v28, %v2922_v5  ;;  %v935_v60 = vsub.f32 %v3116_v18, %v2922_v5 }
 0x1ba   : > { %v1038_v55 = vadd.f32 %v1037_v24, %v975_v8  ;;  %v987_v8 = vmul.f32 %v923_v44, %v923_v44  ;;  %v988_v24 = vmul.f32 %v924_v49, %v924_v49  ;;  %v1294_v57 = vadd.f32 %v1231_v52, %v1230_v39  ;;  %v2019_v44 = vld [vmem:[%s4516_s5 + $0x258] sm:$0xff] }
 0x1bb   : > { %v1238_v49 = vmul.f32 %v1174_v19, %v1174_v19  ;;  %v1177_v52 = vsub.f32 %v2019_v44, %v2922_v5  ;;  %v2025_v19 = vld [vmem:[%s4516_s5 + $0x288] sm:$0xff] }
 0x1bc   : > { %v1039_v59 = vadd.f32 %v1038_v55, %v976_v29  ;;  %v926_v29 = vsub.f32 %v856_v33, %v2922_v5  ;;  %v1171_v55 = vsub.f32 %v2013_v62, %v2922_v5  ;;  %v1295_v1 = vadd.f32 %v1294_v57, %v1232_v14 }
 0x1bd   : > { %v994_v33 = vmul.f32 %v930_v22, %v930_v22 }
 0x1be   : > { %v1040_v0 = vadd.f32 %v1039_v59, %v977_v54  ;;  %v989_v59 = vmul.f32 %v925_v48, %v925_v48  ;;  %v1235_v7 = vmul.f32 %v1171_v55, %v1171_v55  ;;  %v1296_v9 = vadd.f32 %v1295_v1, %v1233_v50  ;;  %v2022_v55 = vld [vmem:[%s4516_s5 + $0x270] sm:$0xff]  ;;  %v3127_v50 = vld [vmem:[%s4516_s5 + $0x108] sm:$0xff] }
 0x1bf   : > { %v936_v40 = vsub.f32 %v3127_v50, %v2922_v5 }
 0x1c0   : > { %v1041_v2 = vadd.f32 %v1040_v0, %v978_v3  ;;  %v927_v3 = vsub.f32 %v857_v58, %v2922_v5  ;;  %v1172_v0 = vsub.f32 %v2014_v43, %v2922_v5 }
 0x1c2   : > { %v1042_v6 = vadd.f32 %v1041_v2, %v979_v16  ;;  %v990_v2 = vmul.f32 %v926_v29, %v926_v29 }
 0x1c4   : > { %v1043_v13 = vadd.f32 %v1042_v6, %v980_v31  ;;  %v928_v31 = vsub.f32 %v858_v37, %v2922_v5  ;;  %v1173_v6 = vsub.f32 %v2015_v63, %v2922_v5  ;;  %v934_v37 = vsub.f32 %v3105_v42, %v2922_v5 }
 0x1c6   : > { %v1044_v21 = vadd.f32 %v1043_v13, %v981_v46  ;;  %v2017_v13 = vld [vmem:[%s4516_s5 + $0x248] sm:$0xff]  ;;  %v992_v26 = vmul.f32 %v928_v31, %v928_v31  ;;  %v1237_v35 = vmul.f32 %v1173_v6, %v1173_v6  ;;  %v1180_v31 = vsub.f32 %v2022_v55, %v2922_v5  ;;  %v2024_v6 = vld [vmem:[%s4516_s5 + $0x280] sm:$0xff] }
 0x1c7   : > { %v1182_v22 = vsub.f32 %v2024_v6, %v2922_v5  ;;  %v3204_v55 = vld [vmem:[%s4516_s5 + $0x140] sm:$0xff] }
 0x1c8   : > { %v1045_v34 = vadd.f32 %v1044_v21, %v982_v12  ;;  %v991_v12 = vmul.f32 %v927_v3, %v927_v3  ;;  %v1297_v21 = vadd.f32 %v1296_v9, %v1234_v11  ;;  %v3138_v11 = vld [vmem:[%s4516_s5 + $0x110] sm:$0xff] }
 0x1c9   : > { %v937_v15 = vsub.f32 %v3138_v11, %v2922_v5 }
 0x1ca   : > { %v1046_v47 = vadd.f32 %v1045_v34, %v983_v20  ;;  %v1236_v20 = vmul.f32 %v1172_v0, %v1172_v0  ;;  %v1175_v34 = vsub.f32 %v2017_v13, %v2922_v5  ;;  %v1298_v36 = vadd.f32 %v1297_v21, %v1235_v7  ;;  %v2023_v0 = vld [vmem:[%s4516_s5 + $0x278] sm:$0xff] }
 0x1cb   : > { %v3149_v7 = vld [vmem:[%s4516_s5 + $0x118] sm:$0xff]  ;;  %v1181_v10 = vsub.f32 %v2023_v0, %v2922_v5  ;;  %v2030_v0 = vld [vmem:[%s4516_s5 + $0x2b0] sm:$0xff] }
 0x1cc   : > { %v1047_v30 = vadd.f32 %v1046_v47, %v984_v32  ;;  %v1239_v48 = vmul.f32 %v1175_v34, %v1175_v34  ;;  %v1000_v34 = vmul.f32 %v936_v40, %v936_v40 }
 0x1cd   : > { %v1245_v44 = vmul.f32 %v1181_v10, %v1181_v10  ;;  %v3226_v10 = vld [vmem:[%s4516_s5 + $0x150] sm:$0xff] }
 0x1ce   : > { %v1048_v4 = vadd.f32 %v1047_v30, %v985_v45  ;;  %v3094_v45 = vld [vmem:[%s4516_s5 + $0xf0] sm:$0xff]  ;;  %v2020_v30 = vld [vmem:[%s4516_s5 + $0x260] sm:$0xff] }
 0x1cf   : > { %v933_v58 = vsub.f32 %v3094_v45, %v2922_v5  ;;  %v1178_v29 = vsub.f32 %v2020_v30, %v2922_v5 }
 0x1d0   : > { %v1049_v54 = vadd.f32 %v1048_v4, %v986_v51  ;;  %v1299_v51 = vadd.f32 %v1298_v36, %v1236_v20  ;;  %v2021_v4 = vld [vmem:[%s4516_s5 + $0x268] sm:$0xff]  ;;  %v3160_v20 = vld [vmem:[%s4516_s5 + $0x120] sm:$0xff] }
 0x1d1   : > { %v1179_v3 = vsub.f32 %v2021_v4, %v2922_v5  ;;  %v3171_v36 = vld [vmem:[%s4516_s5 + $0x128] sm:$0xff] }
 0x1d2   : > { %v1050_v16 = vadd.f32 %v1049_v54, %v987_v8  ;;  %v1300_v62 = vadd.f32 %v1299_v51, %v1237_v35  ;;  %v995_v8 = vmul.f32 %v931_v38, %v931_v38  ;;  %v996_v54 = vmul.f32 %v932_v53, %v932_v53  ;;  %v2026_v35 = vld [vmem:[%s4516_s5 + $0x290] sm:$0xff]  ;;  %v2027_v51 = vld [vmem:[%s4516_s5 + $0x298] sm:$0xff] }
 0x1d3   : > { %v3182_v53 = vld [vmem:[%s4516_s5 + $0x130] sm:$0xff]  ;;  %v1184_v30 = vsub.f32 %v2026_v35, %v2922_v5 }
 0x1d4   : > { %v1051_v46 = vadd.f32 %v1050_v16, %v988_v24  ;;  %v1240_v24 = vmul.f32 %v1176_v25, %v1176_v25  ;;  %v1301_v43 = vadd.f32 %v1300_v62, %v1238_v49  ;;  %v997_v16 = vmul.f32 %v933_v58, %v933_v58  ;;  %v2028_v58 = vld [vmem:[%s4516_s5 + $0x2a0] sm:$0xff] }
 0x1d5   : > { %v939_v25 = vsub.f32 %v3160_v20, %v2922_v5  ;;  %v1001_v49 = vmul.f32 %v937_v15, %v937_v15 }
 0x1d6   : > { %v1052_v17 = vadd.f32 %v1051_v46, %v989_v59  ;;  %v1241_v59 = vmul.f32 %v1177_v52, %v1177_v52  ;;  %v1302_v63 = vadd.f32 %v1301_v43, %v1239_v48  ;;  %v998_v46 = vmul.f32 %v934_v37, %v934_v37 }
 0x1d7   : > { %v940_v48 = vsub.f32 %v3171_v36, %v2922_v5  ;;  %v941_v43 = vsub.f32 %v3182_v53, %v2922_v5  ;;  %v1003_v37 = vmul.f32 %v939_v25, %v939_v25 }
 0x1d8   : > { %v1053_v32 = vadd.f32 %v1052_v17, %v990_v2  ;;  %v1242_v2 = vmul.f32 %v1178_v29, %v1178_v29  ;;  %v1303_v23 = vadd.f32 %v1302_v63, %v1240_v24  ;;  %v999_v17 = vmul.f32 %v935_v60, %v935_v60 }
 0x1d9   : > { %v1005_v6 = vmul.f32 %v941_v43, %v941_v43  ;;  %v2035_v43 = vld [vmem:[%s4516_s5 + $0x2d8] sm:$0xff] }
 0x1da   : > { %v1054_v47 = vadd.f32 %v1053_v32, %v991_v12  ;;  %v1243_v12 = vmul.f32 %v1179_v3, %v1179_v3  ;;  %v1304_v13 = vadd.f32 %v1303_v23, %v1241_v59  ;;  %v938_v32 = vsub.f32 %v3149_v7, %v2922_v5 }
 0x1db   : > { %v1186_v3 = vsub.f32 %v2028_v58, %v2922_v5  ;;  %v1248_v59 = vmul.f32 %v1184_v30, %v1184_v30 }
 0x1dc   : > { %v1055_v39 = vadd.f32 %v1054_v47, %v992_v26  ;;  %v1244_v26 = vmul.f32 %v1180_v31, %v1180_v31  ;;  %v1305_v27 = vadd.f32 %v1304_v13, %v1242_v2  ;;  %v1002_v62 = vmul.f32 %v938_v32, %v938_v32 }
 0x1dd   : > { %v1188_v13 = vsub.f32 %v2030_v0, %v2922_v5  ;;  %v1250_v15 = vmul.f32 %v1186_v3, %v1186_v3  ;;  %v3281_v0 = vld [vmem:[%s4516_s5 + $0x178] sm:$0xff] }
 0x1de   : > { %v1056_v14 = vadd.f32 %v1055_v39, %v993_v41  ;;  %v1183_v41 = vsub.f32 %v2025_v19, %v2922_v5  ;;  %v1306_v47 = vadd.f32 %v1305_v27, %v1243_v12  ;;  %v1246_v39 = vmul.f32 %v1182_v22, %v1182_v22  ;;  %v2032_v22 = vld [vmem:[%s4516_s5 + $0x2c0] sm:$0xff] }
 0x1e0   : > { %v1057_v57 = vadd.f32 %v1056_v14, %v994_v33  ;;  %v1307_v52 = vadd.f32 %v1306_v47, %v1244_v26  ;;  %v1185_v14 = vsub.f32 %v2027_v51, %v2922_v5  ;;  %v1247_v29 = vmul.f32 %v1183_v41, %v1183_v41  ;;  %v3237_v26 = vld [vmem:[%s4516_s5 + $0x158] sm:$0xff]  ;;  %v3248_v47 = vld [vmem:[%s4516_s5 + $0x160] sm:$0xff] }
 0x1e1   : > { %v1252_v51 = vmul.f32 %v1188_v13, %v1188_v13  ;;  %v946_v30 = vsub.f32 %v3237_v26, %v2922_v5 }
 0x1e2   : > { %v1058_v1 = vadd.f32 %v1057_v57, %v995_v8  ;;  %v3193_v8 = vld [vmem:[%s4516_s5 + $0x138] sm:$0xff]  ;;  %v1308_v24 = vadd.f32 %v1307_v52, %v1245_v44  ;;  %v1249_v23 = vmul.f32 %v1185_v14, %v1185_v14  ;;  %v2033_v44 = vld [vmem:[%s4516_s5 + $0x2c8] sm:$0xff]  ;;  %v2034_v52 = vld [vmem:[%s4516_s5 + $0x2d0] sm:$0xff] }
 0x1e3   : > { %v942_v60 = vsub.f32 %v3193_v8, %v2922_v5  ;;  %v1191_v58 = vsub.f32 %v2033_v44, %v2922_v5 }
 0x1e4   : > { %v1059_v9 = vadd.f32 %v1058_v1, %v996_v54  ;;  %v2029_v54 = vld [vmem:[%s4516_s5 + $0x2a8] sm:$0xff]  ;;  %v1309_v63 = vadd.f32 %v1308_v24, %v1246_v39 }
 0x1e5   : > { %v3215_v1 = vld [vmem:[%s4516_s5 + $0x148] sm:$0xff]  ;;  %v1187_v2 = vsub.f32 %v2029_v54, %v2922_v5 }
 0x1e6   : > { %v1060_v21 = vadd.f32 %v1059_v9, %v997_v16  ;;  %v1004_v16 = vmul.f32 %v940_v48, %v940_v48  ;;  %v1310_v40 = vadd.f32 %v1309_v63, %v1247_v29  ;;  %v2031_v9 = vld [vmem:[%s4516_s5 + $0x2b8] sm:$0xff]  ;;  %v944_v19 = vsub.f32 %v3215_v1, %v2922_v5  ;;  %v3259_v48 = vld [vmem:[%s4516_s5 + $0x168] sm:$0xff] }
 0x1e7   : > { %v1189_v32 = vsub.f32 %v2031_v9, %v2922_v5  ;;  %v947_v29 = vsub.f32 %v3248_v47, %v2922_v5  ;;  %v948_v63 = vsub.f32 %v3259_v48, %v2922_v5  ;;  %v2037_v9 = vld [vmem:[%s4516_s5 + $0x2e8] sm:$0xff] }
 0x1e8   : > { %v1061_v38 = vadd.f32 %v1060_v21, %v998_v46  ;;  %v943_v46 = vsub.f32 %v3204_v55, %v2922_v5  ;;  %v1006_v21 = vmul.f32 %v942_v60, %v942_v60  ;;  %v1008_v39 = vmul.f32 %v944_v19, %v944_v19 }
 0x1e9   : > { %v1010_v60 = vmul.f32 %v946_v30, %v946_v30 }
 0x1ea   : > { %v1062_v33 = vadd.f32 %v1061_v38, %v999_v17  ;;  %v1311_v17 = vadd.f32 %v1310_v40, %v1248_v59  ;;  %v945_v38 = vsub.f32 %v3226_v10, %v2922_v5  ;;  %v1007_v41 = vmul.f32 %v943_v46, %v943_v46 }
 0x1ec   : > { %v1063_v4 = vadd.f32 %v1062_v33, %v1000_v34  ;;  %v1251_v34 = vmul.f32 %v1187_v2, %v1187_v2  ;;  %v1312_v35 = vadd.f32 %v1311_v17, %v1249_v23  ;;  %v1009_v24 = vmul.f32 %v945_v38, %v945_v38 }
 0x1ed   : > { %v1193_v2 = vsub.f32 %v2035_v43, %v2922_v5  ;;  %v1255_v23 = vmul.f32 %v1191_v58, %v1191_v58 }
 0x1ee   : > { %v1064_v57 = vadd.f32 %v1063_v4, %v1001_v49  ;;  %v1190_v49 = vsub.f32 %v2032_v22, %v2922_v5  ;;  %v1313_v33 = vadd.f32 %v1312_v35, %v1250_v15  ;;  %v1253_v4 = vmul.f32 %v1189_v32, %v1189_v32  ;;  %v3303_v32 = vld [vmem:[%s4516_s5 + $0x188] sm:$0xff] }
 0x1ef   : > { %v1012_v22 = vmul.f32 %v948_v63, %v948_v63  ;;  %v1195_v35 = vsub.f32 %v2037_v9, %v2922_v5  ;;  %v1257_v38 = vmul.f32 %v1193_v2, %v1193_v2  ;;  %v3336_v63 = vld [vmem:[%s4516_s5 + $0x1a0] sm:$0xff] }
 0x1f0   : > { %v1065_v31 = vadd.f32 %v1064_v57, %v1002_v62  ;;  %v1314_v14 = vadd.f32 %v1313_v33, %v1251_v34  ;;  %v1192_v57 = vsub.f32 %v2034_v52, %v2922_v5  ;;  %v1254_v3 = vmul.f32 %v1190_v49, %v1190_v49  ;;  %v2039_v49 = vld [vmem:[%s4516_s5 + $0x2f8] sm:$0xff] }
 0x1f1   : > { %v1259_v43 = vmul.f32 %v1195_v35, %v1195_v35 }
 0x1f2   : > { %v1066_v12 = vadd.f32 %v1065_v31, %v1003_v37  ;;  %v3270_v37 = vld [vmem:[%s4516_s5 + $0x170] sm:$0xff]  ;;  %v1315_v59 = vadd.f32 %v1314_v14, %v1252_v51  ;;  %v1256_v17 = vmul.f32 %v1192_v57, %v1192_v57  ;;  %v3325_v14 = vld [vmem:[%s4516_s5 + $0x198] sm:$0xff] }
 0x1f3   : > { %v949_v46 = vsub.f32 %v3270_v37, %v2922_v5  ;;  %v3314_v51 = vld [vmem:[%s4516_s5 + $0x190] sm:$0xff] }
 0x1f4   : > { %v1067_v27 = vadd.f32 %v1066_v12, %v1004_v16  ;;  %v2036_v16 = vld [vmem:[%s4516_s5 + $0x2e0] sm:$0xff]  ;;  %v1316_v40 = vadd.f32 %v1315_v59, %v1253_v4  ;;  %v953_v57 = vsub.f32 %v3314_v51, %v2922_v5  ;;  %v2041_v59 = vld [vmem:[%s4516_s5 + $0x308] sm:$0xff] }
 0x1f5   : > { %v3292_v12 = vld [vmem:[%s4516_s5 + $0x180] sm:$0xff]  ;;  %v1194_v15 = vsub.f32 %v2036_v16, %v2922_v5  ;;  %v1199_v9 = vsub.f32 %v2041_v59, %v2922_v5 }
 0x1f6   : > { %v1068_v25 = vadd.f32 %v1067_v27, %v1005_v6  ;;  %v1011_v6 = vmul.f32 %v947_v29, %v947_v29  ;;  %v1317_v19 = vadd.f32 %v1316_v40, %v1254_v3  ;;  %v2038_v27 = vld [vmem:[%s4516_s5 + $0x2f0] sm:$0xff]  ;;  %v951_v44 = vsub.f32 %v3292_v12, %v2922_v5  ;;  %v2040_v4 = vld [vmem:[%s4516_s5 + $0x300] sm:$0xff] }
 0x1f7   : > { %v1196_v30 = vsub.f32 %v2038_v27, %v2922_v5  ;;  %v1198_v16 = vsub.f32 %v2040_v4, %v2922_v5 }
 0x1f8   : > { %v1069_v62 = vadd.f32 %v1068_v25, %v1006_v21  ;;  %v950_v21 = vsub.f32 %v3281_v0, %v2922_v5  ;;  %v1013_v25 = vmul.f32 %v949_v46, %v949_v46  ;;  %v1015_v3 = vmul.f32 %v951_v44, %v951_v44  ;;  %v2042_v46 = vld [vmem:[%s4516_s5 + $0x310] sm:$0xff]  ;;  %v2044_v44 = vld [vmem:[%s4516_s5 + $0x320] sm:$0xff] }
 0x1f9   : > { %v1262_v35 = vmul.f32 %v1198_v16, %v1198_v16 }
 0x1fa   : > { %v1070_v54 = vadd.f32 %v1069_v62, %v1007_v41  ;;  %v1318_v41 = vadd.f32 %v1317_v19, %v1255_v23  ;;  %v952_v62 = vsub.f32 %v3303_v32, %v2922_v5  ;;  %v1014_v58 = vmul.f32 %v950_v21, %v950_v21  ;;  %v2043_v21 = vld [vmem:[%s4516_s5 + $0x318] sm:$0xff] }
 0x1fb   : > { %v954_v23 = vsub.f32 %v3325_v14, %v2922_v5  ;;  %v1017_v19 = vmul.f32 %v953_v57, %v953_v57 }
 0x1fc   : > { %v1071_v31 = vadd.f32 %v1070_v54, %v1008_v39  ;;  %v1258_v39 = vmul.f32 %v1194_v15, %v1194_v15  ;;  %v1319_v52 = vadd.f32 %v1318_v41, %v1256_v17  ;;  %v1016_v40 = vmul.f32 %v952_v62, %v952_v62  ;;  %v2045_v62 = vld [vmem:[%s4516_s5 + $0x328] sm:$0xff] }
 0x1fd   : > { %v955_v17 = vsub.f32 %v3336_v63, %v2922_v5  ;;  %v1018_v41 = vmul.f32 %v954_v23, %v954_v23  ;;  %v3383_v23 = vld [vmem:[%s4516_s5 + $0x1b8] sm:$0xff] }
 0x1fe   : > { %v1072_v13 = vadd.f32 %v1071_v31, %v1009_v24  ;;  %v1197_v24 = vsub.f32 %v2039_v49, %v2922_v5  ;;  %v1320_v54 = vadd.f32 %v1319_v52, %v1257_v38  ;;  %v1260_v31 = vmul.f32 %v1196_v30, %v1196_v30 }
 0x1ff   : > { %v1201_v49 = vsub.f32 %v2043_v21, %v2922_v5  ;;  %v1019_v52 = vmul.f32 %v955_v17, %v955_v17  ;;  %v958_v21 = vsub.f32 %v3383_v23, %v2922_v5 }
 0x200   : > { %v1073_v34 = vadd.f32 %v1072_v13, %v1010_v60  ;;  %v1321_v2 = vadd.f32 %v1320_v54, %v1258_v39  ;;  %v1261_v13 = vmul.f32 %v1197_v24, %v1197_v24  ;;  %v2046_v54 = vld [vmem:[%s4516_s5 + $0x330] sm:$0xff] }
 0x201   : > { %v1265_v59 = vmul.f32 %v1201_v49, %v1201_v49  ;;  %v2050_v49 = vld [vmem:[%s4516_s5 + $0x350] sm:$0xff] }
 0x202   : > { %v1074_v33 = vadd.f32 %v1073_v34, %v1011_v6  ;;  %v1322_v15 = vadd.f32 %v1321_v2, %v1259_v43  ;;  %v1200_v34 = vsub.f32 %v2042_v46, %v2922_v5  ;;  %v2047_v2 = vld [vmem:[%s4516_s5 + $0x338] sm:$0xff]  ;;  %v1204_v46 = vsub.f32 %v2046_v54, %v2922_v5 }
 0x204   : > { %v1075_v29 = vadd.f32 %v1074_v33, %v1012_v22  ;;  %v3353_v22 = vld [vmem:[%s4516_s5 + $0x1a8] sm:$0xff]  ;;  %v1323_v38 = vadd.f32 %v1322_v15, %v1260_v31  ;;  %v1263_v33 = vmul.f32 %v1199_v9, %v1199_v9  ;;  %v1264_v24 = vmul.f32 %v1200_v34, %v1200_v34 }
 0x205   : > { %v956_v39 = vsub.f32 %v3353_v22, %v2922_v5  ;;  %v1205_v15 = vsub.f32 %v2047_v2, %v2922_v5  ;;  %v2049_v34 = vld [vmem:[%s4516_s5 + $0x348] sm:$0xff] }
 0x206   : > { %v1076_v60 = vadd.f32 %v1075_v29, %v1013_v25  ;;  %v1324_v30 = vadd.f32 %v1323_v38, %v1261_v13  ;;  %v1202_v29 = vsub.f32 %v2044_v44, %v2922_v5  ;;  %v2048_v13 = vld [vmem:[%s4516_s5 + $0x340] sm:$0xff]  ;;  %v1268_v44 = vmul.f32 %v1204_v46, %v1204_v46  ;;  %v3428_v46 = vld [vmem:[%s4516_s5 + $0x1d0] sm:$0xff] }
 0x207   : > { %v1020_v31 = vmul.f32 %v956_v39, %v956_v39 }
 0x208   : > { %v1077_v6 = vadd.f32 %v1076_v60, %v1014_v58  ;;  %v3368_v58 = vld [vmem:[%s4516_s5 + $0x1b0] sm:$0xff]  ;;  %v1325_v43 = vadd.f32 %v1324_v30, %v1262_v35  ;;  %v3398_v35 = vld [vmem:[%s4516_s5 + $0x1c0] sm:$0xff]  ;;  %v1269_v30 = vmul.f32 %v1205_v15, %v1205_v15 }
 0x209   : > { %v957_v16 = vsub.f32 %v3368_v58, %v2922_v5 }
 0x20a   : > { %v1078_v27 = vadd.f32 %v1077_v6, %v1015_v3  ;;  %v1203_v3 = vsub.f32 %v2045_v62, %v2922_v5  ;;  %v1326_v60 = vadd.f32 %v1325_v43, %v1263_v33  ;;  %v1266_v6 = vmul.f32 %v1202_v29, %v1202_v29  ;;  %v3413_v29 = vld [vmem:[%s4516_s5 + $0x1c8] sm:$0xff] }
 0x20b   : > { %v1207_v33 = vsub.f32 %v2049_v34, %v2922_v5  ;;  %v1022_v62 = vmul.f32 %v958_v21, %v958_v21  ;;  %v1208_v43 = vsub.f32 %v2050_v49, %v2922_v5  ;;  %v961_v34 = vsub.f32 %v3428_v46, %v2922_v5 }
 0x20c   : > { %v1079_v25 = vadd.f32 %v1078_v27, %v1016_v40  ;;  %v1327_v9 = vadd.f32 %v1326_v60, %v1264_v24  ;;  %v1267_v17 = vmul.f32 %v1203_v3, %v1203_v3  ;;  %v1021_v27 = vmul.f32 %v957_v16, %v957_v16  ;;  %v2052_v3 = vld [vmem:[%s4516_s5 + $0x360] sm:$0xff] }
 0x20d   : > { %v1271_v60 = vmul.f32 %v1207_v33, %v1207_v33 }
 0x20e   : > { %v1080_v4 = vadd.f32 %v1079_v25, %v1017_v19  ;;  %v1328_v19 = vadd.f32 %v1327_v9, %v1265_v59  ;;  %v1210_v9 = vsub.f32 %v2052_v3, %v2922_v5 }
 0x210   : > { %v1081_v57 = vadd.f32 %v1080_v4, %v1018_v41  ;;  %v1206_v41 = vsub.f32 %v2048_v13, %v2922_v5  ;;  %v1329_v25 = vadd.f32 %v1328_v19, %v1266_v6  ;;  %v2051_v4 = vld [vmem:[%s4516_s5 + $0x358] sm:$0xff]  ;;  %v1272_v13 = vmul.f32 %v1208_v43, %v1208_v43 }
 0x211   : > { %v1209_v59 = vsub.f32 %v2051_v4, %v2922_v5  ;;  %v1274_v33 = vmul.f32 %v1210_v9, %v1210_v9  ;;  %v1025_v43 = vmul.f32 %v961_v34, %v961_v34 }
 0x212   : > { %v1082_v40 = vadd.f32 %v1081_v57, %v1019_v52  ;;  %v1330_v39 = vadd.f32 %v1329_v25, %v1267_v17  ;;  %v959_v52 = vsub.f32 %v3398_v35, %v2922_v5  ;;  %v1270_v54 = vmul.f32 %v1206_v41, %v1206_v41  ;;  %v2054_v17 = vld [vmem:[%s4516_s5 + $0x370] sm:$0xff]  ;;  %v2055_v41 = vld [vmem:[%s4516_s5 + $0x378] sm:$0xff] }
 0x213   : > { %v1273_v21 = vmul.f32 %v1209_v59, %v1209_v59  ;;  %v1212_v49 = vsub.f32 %v2054_v17, %v2922_v5  ;;  %v3473_v17 = vld [vmem:[%s4516_s5 + $0x1e8] sm:$0xff] }
 0x214   : > { %v1083_v38 = vadd.f32 %v1082_v40, %v1020_v31  ;;  %v1331_v57 = vadd.f32 %v1330_v39, %v1268_v44  ;;  %v960_v31 = vsub.f32 %v3413_v29, %v2922_v5  ;;  %v1023_v2 = vmul.f32 %v959_v52, %v959_v52  ;;  %v2053_v40 = vld [vmem:[%s4516_s5 + $0x368] sm:$0xff]  ;;  %v3443_v44 = vld [vmem:[%s4516_s5 + $0x1d8] sm:$0xff]  ;;  %v2056_v39 = vld [vmem:[%s4516_s5 + $0x380] sm:$0xff] }
 0x215   : > { %v1211_v19 = vsub.f32 %v2053_v40, %v2922_v5  ;;  %v1213_v52 = vsub.f32 %v2055_v41, %v2922_v5  ;;  %v1214_v59 = vsub.f32 %v2056_v39, %v2922_v5  ;;  %v2061_v39 = vld [vmem:[%s4516_s5 + $0x3a8] sm:$0xff] }
 0x216   : > { %v1084_v24 = vadd.f32 %v1083_v38, %v1021_v27  ;;  %v1332_v16 = vadd.f32 %v1331_v57, %v1269_v30  ;;  %v1024_v38 = vmul.f32 %v960_v31, %v960_v31  ;;  %v3458_v57 = vld [vmem:[%s4516_s5 + $0x1e0] sm:$0xff]  ;;  %v2058_v31 = vld [vmem:[%s4516_s5 + $0x390] sm:$0xff] }
 0x217   : > { %v1277_v40 = vmul.f32 %v1213_v52, %v1213_v52  ;;  %v963_v9 = vsub.f32 %v3458_v57, %v2922_v5  ;;  %v3488_v52 = vld [vmem:[%s4516_s5 + $0x1f0] sm:$0xff] }
 0x218   : > { %v1085_v6 = vadd.f32 %v1084_v24, %v1022_v62  ;;  %v1333_v15 = vadd.f32 %v1332_v16, %v1270_v54  ;;  %v1275_v62 = vmul.f32 %v1211_v19, %v1211_v19  ;;  %v962_v24 = vsub.f32 %v3443_v44, %v2922_v5  ;;  %v2057_v54 = vld [vmem:[%s4516_s5 + $0x388] sm:$0xff]  ;;  %4519 = vst [vmem:[#allocation3_spill] sm:$0xff] %v3488_v52 }
 0x21a   : > { %v1334_v27 = vadd.f32 %v1333_v15, %v1271_v60  ;;  %v1086_v25 = vadd.f32 %v1085_v6, %v1023_v2  ;;  %v1276_v60 = vmul.f32 %v1212_v49, %v1212_v49  ;;  %v1215_v2 = vsub.f32 %v2057_v54, %v2922_v5  ;;  %v2059_v15 = vld [vmem:[%s4516_s5 + $0x398] sm:$0xff]  ;;  %v2062_v54 = vld [vmem:[%s4516_s5 + $0x3b0] sm:$0xff] }
 0x21b   : > { %v1217_v41 = vsub.f32 %v2059_v15, %v2922_v5 }
 0x21c   : > { %v1335_v30 = vadd.f32 %v1334_v27, %v1272_v13  ;;  %v1087_v3 = vadd.f32 %v1086_v25, %v1024_v38  ;;  %v1026_v13 = vmul.f32 %v962_v24, %v962_v24  ;;  %v1278_v27 = vmul.f32 %v1214_v59, %v1214_v59  ;;  %v2060_v38 = vld [vmem:[%s4516_s5 + $0x3a0] sm:$0xff] }
 0x21d   : > { %v1279_v25 = vmul.f32 %v1215_v2, %v1215_v2  ;;  %v1281_v59 = vmul.f32 %v1217_v41, %v1217_v41  ;;  %v2063_v2 = vld [vmem:[%s4516_s5 + $0x3b8] sm:$0xff] }
 0x21e   : > { %v1336_v4 = vadd.f32 %v1335_v30, %v1273_v21  ;;  %v1088_v19 = vadd.f32 %v1087_v3, %v1025_v43  ;;  %v1216_v21 = vsub.f32 %v2058_v31, %v2922_v5  ;;  %v1027_v30 = vmul.f32 %v963_v9, %v963_v9 }
 0x21f   : > { %v1219_v3 = vsub.f32 %v2061_v39, %v2922_v5  ;;  %v1220_v9 = vsub.f32 %v2062_v54, %v2922_v5 }
 0x220   : > { %v1337_v16 = vadd.f32 %v1336_v4, %v1274_v33  ;;  %v964_v33 = vsub.f32 %v3473_v17, %v2922_v5  ;;  %v1218_v4 = vsub.f32 %v2060_v38, %v2922_v5  ;;  %v1280_v24 = vmul.f32 %v1216_v21, %v1216_v21 }
 0x221   : > { %v1221_v21 = vsub.f32 %v2063_v2, %v2922_v5  ;;  %v2068_v2 = vld [vmem:[%s4516_s5 + $0x3e0] sm:$0xff] }
 0x222   : > { %v1338_v6 = vadd.f32 %v1337_v16, %v1275_v62  ;;  %v1089_v62 = vadd.f32 %v1088_v19, %v1026_v13  ;;  %v965_v16 = vsub.f32 %v3488_v52, %v2922_v5  ;;  %v1028_v31 = vmul.f32 %v964_v33, %v964_v33  ;;  %v2064_v19 = vld [vmem:[%s4516_s5 + $0x3c0] sm:$0xff] }
 0x223   : > { %v1282_v13 = vmul.f32 %v1218_v4, %v1218_v4  ;;  %v1222_v33 = vsub.f32 %v2064_v19, %v2922_v5 }
 0x224   : > { %v1339_v34 = vadd.f32 %v1338_v6, %v1276_v60  ;;  %v1090_v6 = vadd.f32 %v1089_v62, %v1027_v30  ;;  %v1029_v41 = vmul.f32 %v965_v16, %v965_v16  ;;  %v1284_v30 = vmul.f32 %v1220_v9, %v1220_v9  ;;  %v2066_v62 = vld [vmem:[%s4516_s5 + $0x3d0] sm:$0xff] }
 0x225   : > { %v1286_v16 = vmul.f32 %v1222_v33, %v1222_v33  ;;  %v2071_v33 = vld [vmem:[%s4516_s5 + $0x3f8] sm:$0xff] }
 0x226   : > { %v1340_v49 = vadd.f32 %v1339_v34, %v1277_v40  ;;  %v3503_v40 = vld [vmem:[%s4516_s5 + $0x1f8] sm:$0xff] }
 0x227   : > { %4520 = vst [vmem:[#allocation4_spill] sm:$0xff] %v3503_v40  ;;  %v966_v38 = vsub.f32 %v3503_v40, %v2922_v5 }
 0x228   : > { %v1341_v43 = vadd.f32 %v1340_v49, %v1278_v27  ;;  %v1283_v27 = vmul.f32 %v1219_v3, %v1219_v3  ;;  %v1091_v49 = vadd.f32 %v1090_v6, %v1028_v31  ;;  %v2067_v3 = vld [vmem:[%s4516_s5 + $0x3d8] sm:$0xff] }
 0x229   : > { %v1030_v54 = vmul.f32 %v966_v38, %v966_v38  ;;  %v1225_v6 = vsub.f32 %v2067_v3, %v2922_v5  ;;  %v2070_v38 = vld [vmem:[%s4516_s5 + $0x3f0] sm:$0xff] }
 0x22a   : > { %v1342_v60 = vadd.f32 %v1341_v43, %v1279_v25  ;;  %v2065_v25 = vld [vmem:[%s4516_s5 + $0x3c8] sm:$0xff] }
 0x22b   : > { %v1223_v4 = vsub.f32 %v2065_v25, %v2922_v5  ;;  %v1289_v25 = vmul.f32 %v1225_v6, %v1225_v6 }
 0x22c   : > { %v1343_v15 = vadd.f32 %v1342_v60, %v1280_v24  ;;  %v1285_v24 = vmul.f32 %v1221_v21, %v1221_v21  ;;  %v1224_v60 = vsub.f32 %v2066_v62, %v2922_v5  ;;  %v1226_v21 = vsub.f32 %v2068_v2, %v2922_v5 }
 0x22d   : > { %v1287_v9 = vmul.f32 %v1223_v4, %v1223_v4 }
 0x22e   : > { %v1344_v34 = vadd.f32 %v1343_v15, %v1281_v59  ;;  %v1092_v59 = vadd.f32 %v1091_v49, %v1029_v41  ;;  %v2069_v15 = vld [vmem:[%s4516_s5 + $0x3e8] sm:$0xff]  ;;  %v1290_v62 = vmul.f32 %v1226_v21, %v1226_v21 }
 0x22f   : > { %v1227_v41 = vsub.f32 %v2069_v15, %v2922_v5 }
 0x230   : > { %v1345_v39 = vadd.f32 %v1344_v34, %v1282_v13  ;;  %v1093_v19 = vadd.f32 %v1092_v59, %v1030_v54 }
 0x232   : > { %v1346_v43 = vadd.f32 %v1345_v39, %v1283_v27  ;;  %v1288_v27 = vmul.f32 %v1224_v60, %v1224_v60  ;;  %v1228_v39 = vsub.f32 %v2070_v38, %v2922_v5 }
 0x234   : > { %v1347_v31 = vadd.f32 %v1346_v43, %v1284_v30  ;;  %v1094_v30 = vrot.slane %v1093_v19, 4  ;;  %v1291_v43 = vmul.f32 %v1227_v41, %v1227_v41  ;;  %v1292_v59 = vmul.f32 %v1228_v39, %v1228_v39 }
 0x236   : > { %v1348_v13 = vadd.f32 %v1347_v31, %v1285_v24  ;;  %v1229_v24 = vsub.f32 %v2071_v33, %v2922_v5  ;;  %v1095_v3 = vadd.f32 %v1094_v30, %v1093_v19 }
 0x238   : > { %v1349_v34 = vadd.f32 %v1348_v13, %v1286_v16  ;;  %v1293_v16 = vmul.f32 %v1229_v24, %v1229_v24  ;;  %v1096_v2 = vrot.slane %v1095_v3, 2  ;;  %v1377_v24 = vld [vmem:[%s4515_s4] sm:$0x1] }
 0x23a   : > { %v1350_v49 = vadd.f32 %v1349_v34, %v1287_v9  ;;  %v1097_v13 = vadd.f32 %v1096_v2, %v1095_v3 }
 0x23c   : > { %v1351_v4 = vadd.f32 %v1350_v49, %v1288_v27  ;;  %v1098_v40 = vrot.slane %v1097_v13, 1 }
 0x23e   : > { %v1352_v54 = vadd.f32 %v1351_v4, %v1289_v25  ;;  %v1099_v21 = vadd.f32 %v1098_v40, %v1097_v13  ;;  %v1375_v4 = vld [vmem:[%s4514_s3] sm:$0x1] }
 0x23f   : > { %v2475_v13 = vld [vmem:[%s4516_s5 + $0x20] sm:$0xff] }
 0x240   : > { %v1353_v60 = vadd.f32 %v1352_v54, %v1290_v62 }
 0x242   : > { %v1354_v31 = vadd.f32 %v1353_v60, %v1291_v43 }
 0x244   : > { %v1355_v6 = vadd.f32 %v1354_v31, %v1292_v59  ;;  %v2471_v59 = vld [vmem:[%s4516_s5] sm:$0xff] }
 0x246   : > { %v1356_v9 = vadd.f32 %v1355_v6, %v1293_v16  ;;  %v2472_v16 = vld [vmem:[%s4516_s5 + $0x8] sm:$0xff]  ;;  %v2474_v6 = vld [vmem:[%s4516_s5 + $0x18] sm:$0xff] }
 0x248   : > { %v1357_v15 = vrot.slane %v1356_v9, 4 }
 0x24a   : > { %v1358_v34 = vadd.f32 %v1357_v15, %v1356_v9 }
 0x24c   : > { %v1359_v52 = vrot.slane %v1358_v34, 2 }
 0x24e   : > { %v1360_v38 = vadd.f32 %v1359_v52, %v1358_v34  ;;  %v2476_v34 = vld [vmem:[%s4516_s5 + $0x28] sm:$0xff] }
 0x250   : > { %v1361_v27 = vrot.slane %v1360_v38, 1 }
 0x252   : > { %v1362_v49 = vadd.f32 %v1361_v27, %v1360_v38 }
 0x254   : > { %v1363_v5 = vadd.f32 %v1362_v49, %v1099_v21  ;;  %v2477_v21 = vld [vmem:[%s4516_s5 + $0x30] sm:$0xff] }
 0x256   : > { %v1364_v41 = vmul.f32 0.0009765625, %v1363_v5  ;;  %v2478_v5 = vld [vmem:[%s4516_s5 + $0x38] sm:$0xff] }
 0x258   : > { %v1365_v25 = vadd.f32 1e-05, %v1364_v41 }
 0x25a   : > { %2467 = vrsqrt.f32 %v1365_v25  ;;  %vm1368_vm0 = vcmp.eq.f32.partialorder %v1365_v25, inf  ;;  %v1371_v33 = vand.u32 2147483648, %v1365_v25  ;;  %vm1370_vm1 = vcmp.eq.f32.partialorder %v1365_v25, 0.0 }
 0x264   : > { %v2468_v19 = vpop.eup %2467 }
 0x265   : > { %v1367_v30 = vmul.f32 %v2468_v19, %v1365_v25 }
 0x267   : > { %v1369_v39 = vsel %vm1368_vm0, %v1365_v25, %v1367_v30  ;;  %v2479_v25 = vld [vmem:[%s4516_s5 + $0x40] sm:$0xff] }
 0x268   : > { %v1372_v62 = vsel %vm1370_vm1, %v1371_v33, %v1369_v39  ;;  %v2480_v33 = vld [vmem:[%s4516_s5 + $0x48] sm:$0xff] }
 0x269   : > { %2469 = vrcp.f32 %v1372_v62  ;;  %v2482_v62 = vld [vmem:[%s4516_s5 + $0x58] sm:$0xff] }
 0x273   : > { %v2470_v52 = vpop.eup %2469 }
 0x274   : > { %v1376_v40 = vmul.f32 %v2470_v52, %v1375_v4  ;;  %v2483_v52 = vld [vmem:[%s4516_s5 + $0x60] sm:$0xff] }
 0x276   : > { %v1378_v43 = vmul.f32 %v1376_v40, %v2916_v56  ;;  %v3549_v54 = vrot.slane %v1376_v40, %v2918_v61  ;;  %v2473_v56 = vld [vmem:[%s4516_s5 + $0x10] sm:$0xff] }
 0x278   : > { %v1379_v3 = vsub.f32 %v1377_v24, %v1378_v43  ;;  %v1386_v60 = vmul.f32 %v2471_v59, %v3549_v54  ;;  %v1387_v31 = vmul.f32 %v2472_v16, %v3549_v54  ;;  %v1388_v2 = vmul.f32 %v2473_v56, %v3549_v54  ;;  %v2484_v24 = vld [vmem:[%s4516_s5 + $0x68] sm:$0xff] }
 0x279   : > { %v1389_v9 = vmul.f32 %v2474_v6, %v3549_v54  ;;  %v1390_v15 = vmul.f32 %v2475_v13, %v3549_v54  ;;  %v1391_v38 = vmul.f32 %v2476_v34, %v3549_v54  ;;  %v1392_v27 = vmul.f32 %v2477_v21, %v3549_v54 }
 0x27a   : > { %v3580_v49 = vrot.slane %v1379_v3, %v2918_v61  ;;  %v1393_v41 = vmul.f32 %v2478_v5, %v3549_v54  ;;  %v1394_v19 = vmul.f32 %v2479_v25, %v3549_v54  ;;  %v1395_v30 = vmul.f32 %v2480_v33, %v3549_v54  ;;  %v2481_v61 = vld [vmem:[%s4516_s5 + $0x50] sm:$0xff] }
 0x27b   : > { %v1396_v39 = vmul.f32 %v2481_v61, %v3549_v54  ;;  %v1397_v4 = vmul.f32 %v2482_v62, %v3549_v54  ;;  %v1398_v40 = vmul.f32 %v2483_v52, %v3549_v54  ;;  %v1399_v43 = vmul.f32 %v2484_v24, %v3549_v54 }
 0x27c   : > { %v1456_v3 = vadd.f32 %v3580_v49, %v1386_v60  ;;  %v1457_v59 = vadd.f32 %v3580_v49, %v1387_v31  ;;  %v1458_v16 = vadd.f32 %v3580_v49, %v1388_v2  ;;  %v1459_v56 = vadd.f32 %v3580_v49, %v1389_v9 }
 0x27d   : > { %v1460_v6 = vadd.f32 %v3580_v49, %v1390_v15  ;;  %v1461_v13 = vadd.f32 %v3580_v49, %v1391_v38  ;;  %v1462_v34 = vadd.f32 %v3580_v49, %v1392_v27  ;;  %v1463_v21 = vadd.f32 %v3580_v49, %v1393_v41 }
 0x27e   : > { %v1520_v5 = vmax.f32 %v1456_v3, 0.0  ;;  %v1521_v25 = vmax.f32 %v1457_v59, 0.0  ;;  %v1522_v33 = vmax.f32 %v1458_v16, 0.0  ;;  %v1523_v61 = vmax.f32 %v1459_v56, 0.0 }
 0x27f   : > { %v1524_v62 = vmax.f32 %v1460_v6, 0.0  ;;  %v1525_v60 = vmax.f32 %v1461_v13, 0.0  ;;  %v1526_v52 = vmax.f32 %v1462_v34, 0.0  ;;  %v1527_v31 = vmax.f32 %v1463_v21, 0.0  ;;  %v2487_v13 = vld [vmem:[%s4516_s5 + $0x80] sm:$0xff]  ;;  %v2488_v21 = vld [vmem:[%s4516_s5 + $0x88] sm:$0xff] }
 0x280   : > { %1584 = vst [vmem:[%s4516_s5] sm:$0xff] %v1520_v5  ;;  %1585 = vst [vmem:[%s4516_s5 + $0x8] sm:$0xff] %v1521_v25  ;;  %v1464_v2 = vadd.f32 %v3580_v49, %v1394_v19  ;;  %v1465_v9 = vadd.f32 %v3580_v49, %v1395_v30  ;;  %v1466_v15 = vadd.f32 %v3580_v49, %v1396_v39  ;;  %v2485_v19 = vld [vmem:[%s4516_s5 + $0x70] sm:$0xff]  ;;  %v2486_v39 = vld [vmem:[%s4516_s5 + $0x78] sm:$0xff] }
 0x281   : > { %1586 = vst [vmem:[%s4516_s5 + $0x10] sm:$0xff] %v1522_v33  ;;  %1587 = vst [vmem:[%s4516_s5 + $0x18] sm:$0xff] %v1523_v61  ;;  %v1467_v38 = vadd.f32 %v3580_v49, %v1397_v4  ;;  %v1468_v27 = vadd.f32 %v3580_v49, %v1398_v40  ;;  %v1469_v41 = vadd.f32 %v3580_v49, %v1399_v43  ;;  %v2489_v25 = vld [vmem:[%s4516_s5 + $0x90] sm:$0xff]  ;;  %v2490_v61 = vld [vmem:[%s4516_s5 + $0x98] sm:$0xff] }
 0x282   : > { %1588 = vst [vmem:[%s4516_s5 + $0x20] sm:$0xff] %v1524_v62  ;;  %1589 = vst [vmem:[%s4516_s5 + $0x28] sm:$0xff] %v1525_v60  ;;  %v1400_v30 = vmul.f32 %v2485_v19, %v3549_v54  ;;  %v1401_v4 = vmul.f32 %v2486_v39, %v3549_v54  ;;  %v1528_v24 = vmax.f32 %v1464_v2, 0.0  ;;  %v1529_v3 = vmax.f32 %v1465_v9, 0.0  ;;  %v2492_v9 = vld [vmem:[%s4516_s5 + $0xa8] sm:$0xff] }
 0x283   : > { %1590 = vst [vmem:[%s4516_s5 + $0x30] sm:$0xff] %v1526_v52  ;;  %1591 = vst [vmem:[%s4516_s5 + $0x38] sm:$0xff] %v1527_v31  ;;  %v1530_v59 = vmax.f32 %v1466_v15, 0.0  ;;  %v1531_v16 = vmax.f32 %v1467_v38, 0.0  ;;  %v1532_v56 = vmax.f32 %v1468_v27, 0.0  ;;  %v1533_v40 = vmax.f32 %v1469_v41, 0.0 }
 0x284   : > { %v1470_v43 = vadd.f32 %v3580_v49, %v1400_v30  ;;  %v1471_v6 = vadd.f32 %v3580_v49, %v1401_v4  ;;  %1592 = vst [vmem:[%s4516_s5 + $0x40] sm:$0xff] %v1528_v24  ;;  %1593 = vst [vmem:[%s4516_s5 + $0x48] sm:$0xff] %v1529_v3  ;;  %v1402_v34 = vmul.f32 %v2487_v13, %v3549_v54  ;;  %v2491_v31 = vld [vmem:[%s4516_s5 + $0xa0] sm:$0xff]  ;;  %v2493_v4 = vld [vmem:[%s4516_s5 + $0xb0] sm:$0xff] }
 0x285   : > { %1594 = vst [vmem:[%s4516_s5 + $0x50] sm:$0xff] %v1530_v59  ;;  %1595 = vst [vmem:[%s4516_s5 + $0x58] sm:$0xff] %v1531_v16  ;;  %v1403_v5 = vmul.f32 %v2488_v21, %v3549_v54  ;;  %v1404_v33 = vmul.f32 %v2489_v25, %v3549_v54  ;;  %v1405_v62 = vmul.f32 %v2490_v61, %v3549_v54  ;;  %v2494_v3 = vld [vmem:[%s4516_s5 + $0xb8] sm:$0xff] }
 0x286   : > { %1596 = vst [vmem:[%s4516_s5 + $0x60] sm:$0xff] %v1532_v56  ;;  %1597 = vst [vmem:[%s4516_s5 + $0x68] sm:$0xff] %v1533_v40  ;;  %v1534_v60 = vmax.f32 %v1470_v43, 0.0  ;;  %v1535_v52 = vmax.f32 %v1471_v6, 0.0  ;;  %v1406_v2 = vmul.f32 %v2491_v31, %v3549_v54  ;;  %v1407_v15 = vmul.f32 %v2492_v9, %v3549_v54 }
 0x287   : > { %v1472_v38 = vadd.f32 %v3580_v49, %v1402_v34  ;;  %v1473_v27 = vadd.f32 %v3580_v49, %v1403_v5  ;;  %v1474_v41 = vadd.f32 %v3580_v49, %v1404_v33  ;;  %v1475_v19 = vadd.f32 %v3580_v49, %v1405_v62  ;;  %v2495_v5 = vld [vmem:[%s4516_s5 + $0xc0] sm:$0xff]  ;;  %v2496_v33 = vld [vmem:[%s4516_s5 + $0xc8] sm:$0xff]  ;;  %v2497_v62 = vld [vmem:[%s4516_s5 + $0xd0] sm:$0xff] }
 0x288   : > { %1598 = vst [vmem:[%s4516_s5 + $0x70] sm:$0xff] %v1534_v60  ;;  %1599 = vst [vmem:[%s4516_s5 + $0x78] sm:$0xff] %v1535_v52  ;;  %v1476_v30 = vadd.f32 %v3580_v49, %v1406_v2  ;;  %v1477_v39 = vadd.f32 %v3580_v49, %v1407_v15  ;;  %v1408_v24 = vmul.f32 %v2493_v4, %v3549_v54  ;;  %v2498_v52 = vld [vmem:[%s4516_s5 + $0xd8] sm:$0xff]  ;;  %v2499_v15 = vld [vmem:[%s4516_s5 + $0xe0] sm:$0xff] }
 0x289   : > { %v1409_v59 = vmul.f32 %v2494_v3, %v3549_v54  ;;  %v1536_v16 = vmax.f32 %v1472_v38, 0.0  ;;  %v1537_v56 = vmax.f32 %v1473_v27, 0.0  ;;  %v1538_v40 = vmax.f32 %v1474_v41, 0.0 }
 0x28a   : > { %v1539_v43 = vmax.f32 %v1475_v19, 0.0  ;;  %v1540_v6 = vmax.f32 %v1476_v30, 0.0  ;;  %v1541_v13 = vmax.f32 %v1477_v39, 0.0  ;;  %v1478_v34 = vadd.f32 %v3580_v49, %v1408_v24 }
 0x28b   : > { %v1479_v21 = vadd.f32 %v3580_v49, %v1409_v59  ;;  %1600 = vst [vmem:[%s4516_s5 + $0x80] sm:$0xff] %v1536_v16  ;;  %1601 = vst [vmem:[%s4516_s5 + $0x88] sm:$0xff] %v1537_v56  ;;  %v1410_v25 = vmul.f32 %v2495_v5, %v3549_v54  ;;  %v1411_v61 = vmul.f32 %v2496_v33, %v3549_v54 }
 0x28c   : > { %1602 = vst [vmem:[%s4516_s5 + $0x90] sm:$0xff] %v1538_v40  ;;  %1603 = vst [vmem:[%s4516_s5 + $0x98] sm:$0xff] %v1539_v43  ;;  %v1412_v60 = vmul.f32 %v2497_v62, %v3549_v54  ;;  %v1413_v31 = vmul.f32 %v2498_v52, %v3549_v54  ;;  %v1542_v2 = vmax.f32 %v1478_v34, 0.0  ;;  %v1414_v38 = vmul.f32 %v2499_v15, %v3549_v54 }
 0x28d   : > { %1604 = vst [vmem:[%s4516_s5 + $0xa0] sm:$0xff] %v1540_v6  ;;  %1605 = vst [vmem:[%s4516_s5 + $0xa8] sm:$0xff] %v1541_v13  ;;  %v1543_v9 = vmax.f32 %v1479_v21, 0.0  ;;  %v1415_v27 = vmul.f32 %v3549_v54, %v3084_v28  ;;  %v1480_v41 = vadd.f32 %v3580_v49, %v1410_v25  ;;  %v1481_v19 = vadd.f32 %v3580_v49, %v1411_v61 }
 0x28e   : > { %v1482_v30 = vadd.f32 %v3580_v49, %v1412_v60  ;;  %v1483_v39 = vadd.f32 %v3580_v49, %v1413_v31  ;;  %1606 = vst [vmem:[%s4516_s5 + $0xb0] sm:$0xff] %v1542_v2  ;;  %v1484_v4 = vadd.f32 %v3580_v49, %v1414_v38  ;;  %v1416_v24 = vmul.f32 %v3549_v54, %v3094_v45 }
 0x28f   : > { %1607 = vst [vmem:[%s4516_s5 + $0xb8] sm:$0xff] %v1543_v9  ;;  %v1485_v28 = vadd.f32 %v3580_v49, %v1415_v27  ;;  %v1417_v3 = vmul.f32 %v3549_v54, %v3105_v42  ;;  %v1544_v59 = vmax.f32 %v1480_v41, 0.0  ;;  %v1545_v16 = vmax.f32 %v1481_v19, 0.0 }
 0x290   : > { %v1546_v56 = vmax.f32 %v1482_v30, 0.0  ;;  %v1547_v40 = vmax.f32 %v1483_v39, 0.0  ;;  %v1548_v43 = vmax.f32 %v1484_v4, 0.0  ;;  %v1486_v13 = vadd.f32 %v3580_v49, %v1416_v24 }
 0x291   : > { %v1549_v6 = vmax.f32 %v1485_v28, 0.0  ;;  %v1487_v34 = vadd.f32 %v3580_v49, %v1417_v3  ;;  %1608 = vst [vmem:[%s4516_s5 + $0xc0] sm:$0xff] %v1544_v59  ;;  %1609 = vst [vmem:[%s4516_s5 + $0xc8] sm:$0xff] %v1545_v16  ;;  %v1418_v45 = vmul.f32 %v3549_v54, %v3116_v18  ;;  %v1419_v42 = vmul.f32 %v3549_v54, %v3127_v50 }
 0x292   : > { %1610 = vst [vmem:[%s4516_s5 + $0xd0] sm:$0xff] %v1546_v56  ;;  %1611 = vst [vmem:[%s4516_s5 + $0xd8] sm:$0xff] %v1547_v40  ;;  %v1420_v21 = vmul.f32 %v3549_v54, %v3138_v11  ;;  %v1421_v5 = vmul.f32 %v3549_v54, %v3149_v7  ;;  %v1550_v25 = vmax.f32 %v1486_v13, 0.0  ;;  %v1422_v18 = vmul.f32 %v3549_v54, %v3160_v20 }
 0x293   : > { %1612 = vst [vmem:[%s4516_s5 + $0xe0] sm:$0xff] %v1548_v43  ;;  %1613 = vst [vmem:[%s4516_s5 + $0xe8] sm:$0xff] %v1549_v6  ;;  %v1551_v33 = vmax.f32 %v1487_v34, 0.0  ;;  %v1423_v50 = vmul.f32 %v3549_v54, %v3171_v36  ;;  %v1488_v11 = vadd.f32 %v3580_v49, %v1418_v45  ;;  %v1489_v7 = vadd.f32 %v3580_v49, %v1419_v42 }
 0x294   : > { %v1490_v61 = vadd.f32 %v3580_v49, %v1420_v21  ;;  %v1491_v62 = vadd.f32 %v3580_v49, %v1421_v5  ;;  %1614 = vst [vmem:[%s4516_s5 + $0xf0] sm:$0xff] %v1550_v25  ;;  %v1492_v20 = vadd.f32 %v3580_v49, %v1422_v18  ;;  %v1424_v60 = vmul.f32 %v3549_v54, %v3182_v53 }
 0x295   : > { %1615 = vst [vmem:[%s4516_s5 + $0xf8] sm:$0xff] %v1551_v33  ;;  %v1493_v36 = vadd.f32 %v3580_v49, %v1423_v50  ;;  %v1425_v52 = vmul.f32 %v3549_v54, %v3193_v8  ;;  %v1552_v31 = vmax.f32 %v1488_v11, 0.0  ;;  %v1553_v2 = vmax.f32 %v1489_v7, 0.0 }
 0x296   : > { %v1554_v9 = vmax.f32 %v1490_v61, 0.0  ;;  %v1555_v15 = vmax.f32 %v1491_v62, 0.0  ;;  %v1556_v38 = vmax.f32 %v1492_v20, 0.0  ;;  %v1494_v41 = vadd.f32 %v3580_v49, %v1424_v60 }
 0x297   : > { %v1557_v27 = vmax.f32 %v1493_v36, 0.0  ;;  %v1495_v19 = vadd.f32 %v3580_v49, %v1425_v52  ;;  %1616 = vst [vmem:[%s4516_s5 + $0x100] sm:$0xff] %v1552_v31  ;;  %1617 = vst [vmem:[%s4516_s5 + $0x108] sm:$0xff] %v1553_v2  ;;  %v1426_v53 = vmul.f32 %v3549_v54, %v3204_v55  ;;  %v1427_v8 = vmul.f32 %v3549_v54, %v3215_v1 }
 0x298   : > { %1618 = vst [vmem:[%s4516_s5 + $0x110] sm:$0xff] %v1554_v9  ;;  %1619 = vst [vmem:[%s4516_s5 + $0x118] sm:$0xff] %v1555_v15  ;;  %v1428_v30 = vmul.f32 %v3549_v54, %v3226_v10  ;;  %v1429_v39 = vmul.f32 %v3549_v54, %v3237_v26  ;;  %v1558_v4 = vmax.f32 %v1494_v41, 0.0  ;;  %v1430_v55 = vmul.f32 %v3549_v54, %v3248_v47 }
 0x299   : > { %1620 = vst [vmem:[%s4516_s5 + $0x120] sm:$0xff] %v1556_v38  ;;  %1621 = vst [vmem:[%s4516_s5 + $0x128] sm:$0xff] %v1557_v27  ;;  %v1559_v28 = vmax.f32 %v1495_v19, 0.0  ;;  %v1431_v1 = vmul.f32 %v3549_v54, %v3259_v48  ;;  %v1496_v10 = vadd.f32 %v3580_v49, %v1426_v53  ;;  %v1497_v26 = vadd.f32 %v3580_v49, %v1427_v8  ;;  %v2072_v53 = vld [vmem:[%s4516_s5 + $0x200] sm:$0xff] }
 0x29a   : > { %v1498_v24 = vadd.f32 %v3580_v49, %v1428_v30  ;;  %v1499_v3 = vadd.f32 %v3580_v49, %v1429_v39  ;;  %1622 = vst [vmem:[%s4516_s5 + $0x130] sm:$0xff] %v1558_v4  ;;  %v1500_v47 = vadd.f32 %v3580_v49, %v1430_v55  ;;  %v1432_v59 = vmul.f32 %v3549_v54, %v3270_v37  ;;  %v4521_v8 = vld [vmem:[#allocation3_spill] sm:$0xff]  ;;  %v4522_v39 = vld [vmem:[#allocation4_spill] sm:$0xff] }
 0x29b   : > { %1623 = vst [vmem:[%s4516_s5 + $0x138] sm:$0xff] %v1559_v28  ;;  %v1501_v48 = vadd.f32 %v3580_v49, %v1431_v1  ;;  %v1433_v16 = vmul.f32 %v3549_v54, %v3281_v0  ;;  %v1560_v56 = vmax.f32 %v1496_v10, 0.0  ;;  %v1561_v40 = vmax.f32 %v1497_v26, 0.0  ;;  %v2073_v28 = vld [vmem:[%s4516_s5 + $0x208] sm:$0xff]  ;;  %v2074_v55 = vld [vmem:[%s4516_s5 + $0x210] sm:$0xff]  ;;  %v2075_v1 = vld [vmem:[%s4516_s5 + $0x218] sm:$0xff] }
 0x29c   : > { %v1562_v43 = vmax.f32 %v1498_v24, 0.0  ;;  %v1563_v6 = vmax.f32 %v1499_v3, 0.0  ;;  %v1564_v13 = vmax.f32 %v1500_v47, 0.0  ;;  %v1502_v45 = vadd.f32 %v3580_v49, %v1432_v59  ;;  %v2076_v47 = vld [vmem:[%s4516_s5 + $0x220] sm:$0xff] }
 0x29d   : > { %v1565_v34 = vmax.f32 %v1501_v48, 0.0  ;;  %v1503_v42 = vadd.f32 %v3580_v49, %v1433_v16  ;;  %1624 = vst [vmem:[%s4516_s5 + $0x140] sm:$0xff] %v1560_v56  ;;  %1625 = vst [vmem:[%s4516_s5 + $0x148] sm:$0xff] %v1561_v40  ;;  %v1434_v37 = vmul.f32 %v3549_v54, %v3292_v12  ;;  %v1435_v0 = vmul.f32 %v3549_v54, %v3303_v32  ;;  %v2077_v48 = vld [vmem:[%s4516_s5 + $0x228] sm:$0xff] }
 0x29e   : > { %1626 = vst [vmem:[%s4516_s5 + $0x150] sm:$0xff] %v1562_v43  ;;  %1627 = vst [vmem:[%s4516_s5 + $0x158] sm:$0xff] %v1563_v6  ;;  %v1436_v21 = vmul.f32 %v3549_v54, %v3314_v51  ;;  %v1437_v5 = vmul.f32 %v3549_v54, %v3325_v14  ;;  %v1566_v25 = vmax.f32 %v1502_v45, 0.0  ;;  %v1438_v12 = vmul.f32 %v3549_v54, %v3336_v63  ;;  %v2078_v45 = vld [vmem:[%s4516_s5 + $0x230] sm:$0xff] }
 0x29f   : > { %1628 = vst [vmem:[%s4516_s5 + $0x160] sm:$0xff] %v1564_v13  ;;  %1629 = vst [vmem:[%s4516_s5 + $0x168] sm:$0xff] %v1565_v34  ;;  %v1567_v33 = vmax.f32 %v1503_v42, 0.0  ;;  %v1439_v32 = vmul.f32 %v3549_v54, %v3353_v22  ;;  %v1504_v51 = vadd.f32 %v3580_v49, %v1434_v37  ;;  %v1505_v14 = vadd.f32 %v3580_v49, %v1435_v0  ;;  %v2079_v42 = vld [vmem:[%s4516_s5 + $0x238] sm:$0xff] }
 0x2a0   : > { %v1506_v18 = vadd.f32 %v3580_v49, %v1436_v21  ;;  %v1507_v50 = vadd.f32 %v3580_v49, %v1437_v5  ;;  %1630 = vst [vmem:[%s4516_s5 + $0x170] sm:$0xff] %v1566_v25  ;;  %v1508_v63 = vadd.f32 %v3580_v49, %v1438_v12  ;;  %v1440_v11 = vmul.f32 %v3549_v54, %v3368_v58 }
 0x2a1   : > { %1631 = vst [vmem:[%s4516_s5 + $0x178] sm:$0xff] %v1567_v33  ;;  %v1509_v22 = vadd.f32 %v3580_v49, %v1439_v32  ;;  %v1441_v7 = vmul.f32 %v3549_v54, %v3383_v23  ;;  %v1568_v61 = vmax.f32 %v1504_v51, 0.0  ;;  %v1569_v62 = vmax.f32 %v1505_v14, 0.0  ;;  %v2080_v51 = vld [vmem:[%s4516_s5 + $0x240] sm:$0xff] }
 0x2a2   : > { %v1570_v20 = vmax.f32 %v1506_v18, 0.0  ;;  %v1571_v36 = vmax.f32 %v1507_v50, 0.0  ;;  %v1572_v60 = vmax.f32 %v1508_v63, 0.0  ;;  %v1510_v31 = vadd.f32 %v3580_v49, %v1440_v11  ;;  %v2082_v11 = vld [vmem:[%s4516_s5 + $0x250] sm:$0xff] }
 0x2a3   : > { %v1573_v52 = vmax.f32 %v1509_v22, 0.0  ;;  %v1511_v2 = vadd.f32 %v3580_v49, %v1441_v7  ;;  %1632 = vst [vmem:[%s4516_s5 + $0x180] sm:$0xff] %v1568_v61  ;;  %1633 = vst [vmem:[%s4516_s5 + $0x188] sm:$0xff] %v1569_v62  ;;  %v1442_v58 = vmul.f32 %v3549_v54, %v3398_v35  ;;  %v1443_v23 = vmul.f32 %v3549_v54, %v3413_v29  ;;  %v2081_v22 = vld [vmem:[%s4516_s5 + $0x248] sm:$0xff]  ;;  %v2083_v7 = vld [vmem:[%s4516_s5 + $0x258] sm:$0xff] }
 0x2a4   : > { %1634 = vst [vmem:[%s4516_s5 + $0x190] sm:$0xff] %v1570_v20  ;;  %1635 = vst [vmem:[%s4516_s5 + $0x198] sm:$0xff] %v1571_v36  ;;  %v1444_v9 = vmul.f32 %v3549_v54, %v3428_v46  ;;  %v1445_v15 = vmul.f32 %v3549_v54, %v3443_v44  ;;  %v1574_v38 = vmax.f32 %v1510_v31, 0.0  ;;  %v1446_v35 = vmul.f32 %v3549_v54, %v3458_v57 }
 0x2a5   : > { %1636 = vst [vmem:[%s4516_s5 + $0x1a0] sm:$0xff] %v1572_v60  ;;  %1637 = vst [vmem:[%s4516_s5 + $0x1a8] sm:$0xff] %v1573_v52  ;;  %v1575_v27 = vmax.f32 %v1511_v2, 0.0  ;;  %v1447_v29 = vmul.f32 %v3549_v54, %v3473_v17  ;;  %v1512_v46 = vadd.f32 %v3580_v49, %v1442_v58  ;;  %v1513_v44 = vadd.f32 %v3580_v49, %v1443_v23  ;;  %v2084_v60 = vld [vmem:[%s4516_s5 + $0x260] sm:$0xff]  ;;  %v2085_v52 = vld [vmem:[%s4516_s5 + $0x268] sm:$0xff] }
 0x2a6   : > { %v1514_v41 = vadd.f32 %v3580_v49, %v1444_v9  ;;  %v1515_v19 = vadd.f32 %v3580_v49, %v1445_v15  ;;  %1638 = vst [vmem:[%s4516_s5 + $0x1b0] sm:$0xff] %v1574_v38  ;;  %v1516_v57 = vadd.f32 %v3580_v49, %v1446_v35  ;;  %v1448_v30 = vmul.f32 %v3549_v54, %v4521_v8  ;;  %v2086_v35 = vld [vmem:[%s4516_s5 + $0x270] sm:$0xff] }
 0x2a7   : > { %1639 = vst [vmem:[%s4516_s5 + $0x1b8] sm:$0xff] %v1575_v27  ;;  %v1517_v17 = vadd.f32 %v3580_v49, %v1447_v29  ;;  %v1449_v4 = vmul.f32 %v3549_v54, %v4522_v39  ;;  %v1576_v10 = vmax.f32 %v1512_v46, 0.0  ;;  %v1577_v26 = vmax.f32 %v1513_v44, 0.0  ;;  %v2087_v29 = vld [vmem:[%s4516_s5 + $0x278] sm:$0xff] }
 0x2a8   : > { %v1578_v24 = vmax.f32 %v1514_v41, 0.0  ;;  %v1579_v3 = vmax.f32 %v1515_v19, 0.0  ;;  %v1580_v59 = vmax.f32 %v1516_v57, 0.0  ;;  %v1518_v56 = vadd.f32 %v3580_v49, %v1448_v30  ;;  %v2088_v30 = vld [vmem:[%s4516_s5 + $0x280] sm:$0xff] }
 0x2a9   : > { %v1581_v16 = vmax.f32 %v1517_v17, 0.0  ;;  %v1519_v40 = vadd.f32 %v3580_v49, %v1449_v4  ;;  %1640 = vst [vmem:[%s4516_s5 + $0x1c0] sm:$0xff] %v1576_v10  ;;  %1641 = vst [vmem:[%s4516_s5 + $0x1c8] sm:$0xff] %v1577_v26  ;;  %v1712_v43 = vmul.f32 %v2072_v53, %v3549_v54  ;;  %v1713_v6 = vmul.f32 %v2073_v28, %v3549_v54  ;;  %v2090_v10 = vld [vmem:[%s4516_s5 + $0x290] sm:$0xff]  ;;  %v2091_v26 = vld [vmem:[%s4516_s5 + $0x298] sm:$0xff] }
 0x2aa   : > { %1642 = vst [vmem:[%s4516_s5 + $0x1d0] sm:$0xff] %v1578_v24  ;;  %1643 = vst [vmem:[%s4516_s5 + $0x1d8] sm:$0xff] %v1579_v3  ;;  %v1714_v13 = vmul.f32 %v2074_v55, %v3549_v54  ;;  %v1715_v34 = vmul.f32 %v2075_v1, %v3549_v54  ;;  %v1582_v37 = vmax.f32 %v1518_v56, 0.0  ;;  %v1716_v21 = vmul.f32 %v2076_v47, %v3549_v54  ;;  %v2089_v1 = vld [vmem:[%s4516_s5 + $0x288] sm:$0xff] }
 0x2ab   : > { %1644 = vst [vmem:[%s4516_s5 + $0x1e0] sm:$0xff] %v1580_v59  ;;  %1645 = vst [vmem:[%s4516_s5 + $0x1e8] sm:$0xff] %v1581_v16  ;;  %v1583_v0 = vmax.f32 %v1519_v40, 0.0  ;;  %v1717_v5 = vmul.f32 %v2077_v48, %v3549_v54  ;;  %v1776_v25 = vadd.f32 %v1712_v43, %v3580_v49  ;;  %v1777_v33 = vadd.f32 %v1713_v6, %v3580_v49  ;;  %v2092_v59 = vld [vmem:[%s4516_s5 + $0x2a0] sm:$0xff]  ;;  %v2093_v16 = vld [vmem:[%s4516_s5 + $0x2a8] sm:$0xff] }
 0x2ac   : > { %v1778_v12 = vadd.f32 %v1714_v13, %v3580_v49  ;;  %v1779_v32 = vadd.f32 %v1715_v34, %v3580_v49  ;;  %1646 = vst [vmem:[%s4516_s5 + $0x1f0] sm:$0xff] %v1582_v37  ;;  %v1780_v14 = vadd.f32 %v1716_v21, %v3580_v49  ;;  %v1718_v50 = vmul.f32 %v2078_v45, %v3549_v54  ;;  %v2094_v37 = vld [vmem:[%s4516_s5 + $0x2b0] sm:$0xff] }
 0x2ad   : > { %1647 = vst [vmem:[%s4516_s5 + $0x1f8] sm:$0xff] %v1583_v0  ;;  %v1781_v18 = vadd.f32 %v1717_v5, %v3580_v49  ;;  %v1719_v63 = vmul.f32 %v2079_v42, %v3549_v54  ;;  %v1840_v61 = vmax.f32 %v1776_v25, 0.0  ;;  %v1841_v62 = vmax.f32 %v1777_v33, 0.0  ;;  %v2095_v0 = vld [vmem:[%s4516_s5 + $0x2b8] sm:$0xff] }
 0x2ae   : > { %v1842_v20 = vmax.f32 %v1778_v12, 0.0  ;;  %v1843_v36 = vmax.f32 %v1779_v32, 0.0  ;;  %v1844_v31 = vmax.f32 %v1780_v14, 0.0  ;;  %v1782_v58 = vadd.f32 %v1718_v50, %v3580_v49 }
 0x2af   : > { %v1845_v2 = vmax.f32 %v1781_v18, 0.0  ;;  %v1783_v23 = vadd.f32 %v1719_v63, %v3580_v49  ;;  %2136 = vst [vmem:[%s4516_s5 + $0x200] sm:$0xff] %v1840_v61  ;;  %2137 = vst [vmem:[%s4516_s5 + $0x208] sm:$0xff] %v1841_v62  ;;  %v1720_v9 = vmul.f32 %v2080_v51, %v3549_v54  ;;  %v1721_v15 = vmul.f32 %v2081_v22, %v3549_v54  ;;  %v2096_v18 = vld [vmem:[%s4516_s5 + $0x2c0] sm:$0xff]  ;;  %v2098_v61 = vld [vmem:[%s4516_s5 + $0x2d0] sm:$0xff] }
 0x2b0   : > { %2138 = vst [vmem:[%s4516_s5 + $0x210] sm:$0xff] %v1842_v20  ;;  %2139 = vst [vmem:[%s4516_s5 + $0x218] sm:$0xff] %v1843_v36  ;;  %v1722_v38 = vmul.f32 %v2082_v11, %v3549_v54  ;;  %v1723_v27 = vmul.f32 %v2083_v7, %v3549_v54  ;;  %v1846_v46 = vmax.f32 %v1782_v58, 0.0  ;;  %v1724_v41 = vmul.f32 %v2084_v60, %v3549_v54  ;;  %v2097_v7 = vld [vmem:[%s4516_s5 + $0x2c8] sm:$0xff]  ;;  %v2099_v62 = vld [vmem:[%s4516_s5 + $0x2d8] sm:$0xff] }
 0x2b1   : > { %2140 = vst [vmem:[%s4516_s5 + $0x220] sm:$0xff] %v1844_v31  ;;  %2141 = vst [vmem:[%s4516_s5 + $0x228] sm:$0xff] %v1845_v2  ;;  %v1847_v44 = vmax.f32 %v1783_v23, 0.0  ;;  %v1725_v19 = vmul.f32 %v2085_v52, %v3549_v54  ;;  %v1784_v53 = vadd.f32 %v1720_v9, %v3580_v49  ;;  %v1785_v57 = vadd.f32 %v1721_v15, %v3580_v49  ;;  %v2100_v31 = vld [vmem:[%s4516_s5 + $0x2e0] sm:$0xff]  ;;  %v2101_v2 = vld [vmem:[%s4516_s5 + $0x2e8] sm:$0xff] }
 0x2b2   : > { %v1786_v17 = vadd.f32 %v1722_v38, %v3580_v49  ;;  %v1787_v8 = vadd.f32 %v1723_v27, %v3580_v49  ;;  %2142 = vst [vmem:[%s4516_s5 + $0x230] sm:$0xff] %v1846_v46  ;;  %v1788_v39 = vadd.f32 %v1724_v41, %v3580_v49  ;;  %v1726_v28 = vmul.f32 %v2086_v35, %v3549_v54  ;;  %v2102_v46 = vld [vmem:[%s4516_s5 + $0x2f0] sm:$0xff] }
 0x2b3   : > { %2143 = vst [vmem:[%s4516_s5 + $0x238] sm:$0xff] %v1847_v44  ;;  %v1789_v4 = vadd.f32 %v1725_v19, %v3580_v49  ;;  %v1727_v55 = vmul.f32 %v2087_v29, %v3549_v54  ;;  %v1848_v24 = vmax.f32 %v1784_v53, 0.0  ;;  %v1849_v3 = vmax.f32 %v1785_v57, 0.0  ;;  %v2103_v44 = vld [vmem:[%s4516_s5 + $0x2f8] sm:$0xff] }
 0x2b4   : > { %v1850_v47 = vmax.f32 %v1786_v17, 0.0  ;;  %v1851_v48 = vmax.f32 %v1787_v8, 0.0  ;;  %v1852_v56 = vmax.f32 %v1788_v39, 0.0  ;;  %v1790_v43 = vadd.f32 %v1726_v28, %v3580_v49 }
 0x2b5   : > { %v1853_v40 = vmax.f32 %v1789_v4, 0.0  ;;  %v1791_v6 = vadd.f32 %v1727_v55, %v3580_v49  ;;  %2144 = vst [vmem:[%s4516_s5 + $0x240] sm:$0xff] %v1848_v24  ;;  %2145 = vst [vmem:[%s4516_s5 + $0x248] sm:$0xff] %v1849_v3  ;;  %v1728_v13 = vmul.f32 %v2088_v30, %v3549_v54  ;;  %v1729_v34 = vmul.f32 %v2089_v1, %v3549_v54  ;;  %v2104_v4 = vld [vmem:[%s4516_s5 + $0x300] sm:$0xff]  ;;  %v2106_v24 = vld [vmem:[%s4516_s5 + $0x310] sm:$0xff] }
 0x2b6   : > { %2146 = vst [vmem:[%s4516_s5 + $0x250] sm:$0xff] %v1850_v47  ;;  %2147 = vst [vmem:[%s4516_s5 + $0x258] sm:$0xff] %v1851_v48  ;;  %v1730_v45 = vmul.f32 %v2090_v10, %v3549_v54  ;;  %v1731_v42 = vmul.f32 %v2091_v26, %v3549_v54  ;;  %v1854_v21 = vmax.f32 %v1790_v43, 0.0  ;;  %v1732_v25 = vmul.f32 %v2092_v59, %v3549_v54  ;;  %v2105_v26 = vld [vmem:[%s4516_s5 + $0x308] sm:$0xff]  ;;  %v2107_v3 = vld [vmem:[%s4516_s5 + $0x318] sm:$0xff] }
 0x2b7   : > { %2148 = vst [vmem:[%s4516_s5 + $0x260] sm:$0xff] %v1852_v56  ;;  %2149 = vst [vmem:[%s4516_s5 + $0x268] sm:$0xff] %v1853_v40  ;;  %v1855_v5 = vmax.f32 %v1791_v6, 0.0  ;;  %v1733_v33 = vmul.f32 %v2093_v16, %v3549_v54  ;;  %v1792_v12 = vadd.f32 %v1728_v13, %v3580_v49  ;;  %v1793_v32 = vadd.f32 %v1729_v34, %v3580_v49  ;;  %v2108_v56 = vld [vmem:[%s4516_s5 + $0x320] sm:$0xff]  ;;  %v2109_v40 = vld [vmem:[%s4516_s5 + $0x328] sm:$0xff] }
 0x2b8   : > { %v1794_v51 = vadd.f32 %v1730_v45, %v3580_v49  ;;  %v1795_v14 = vadd.f32 %v1731_v42, %v3580_v49  ;;  %2150 = vst [vmem:[%s4516_s5 + $0x270] sm:$0xff] %v1854_v21  ;;  %v1796_v50 = vadd.f32 %v1732_v25, %v3580_v49  ;;  %v1734_v22 = vmul.f32 %v2094_v37, %v3549_v54  ;;  %v2110_v21 = vld [vmem:[%s4516_s5 + $0x330] sm:$0xff] }
 0x2b9   : > { %2151 = vst [vmem:[%s4516_s5 + $0x278] sm:$0xff] %v1855_v5  ;;  %v1797_v63 = vadd.f32 %v1733_v33, %v3580_v49  ;;  %v1735_v11 = vmul.f32 %v2095_v0, %v3549_v54  ;;  %v1856_v20 = vmax.f32 %v1792_v12, 0.0  ;;  %v1857_v36 = vmax.f32 %v1793_v32, 0.0  ;;  %v2111_v5 = vld [vmem:[%s4516_s5 + $0x338] sm:$0xff] }
 0x2ba   : > { %v1858_v60 = vmax.f32 %v1794_v51, 0.0  ;;  %v1859_v52 = vmax.f32 %v1795_v14, 0.0  ;;  %v1860_v58 = vmax.f32 %v1796_v50, 0.0  ;;  %v1798_v9 = vadd.f32 %v1734_v22, %v3580_v49 }
 0x2bb   : > { %v1861_v23 = vmax.f32 %v1797_v63, 0.0  ;;  %v1799_v15 = vadd.f32 %v1735_v11, %v3580_v49  ;;  %2152 = vst [vmem:[%s4516_s5 + $0x280] sm:$0xff] %v1856_v20  ;;  %2153 = vst [vmem:[%s4516_s5 + $0x288] sm:$0xff] %v1857_v36  ;;  %v1736_v38 = vmul.f32 %v2096_v18, %v3549_v54  ;;  %v1737_v27 = vmul.f32 %v2097_v7, %v3549_v54  ;;  %v2112_v63 = vld [vmem:[%s4516_s5 + $0x340] sm:$0xff]  ;;  %v2114_v20 = vld [vmem:[%s4516_s5 + $0x350] sm:$0xff] }
 0x2bc   : > { %2154 = vst [vmem:[%s4516_s5 + $0x290] sm:$0xff] %v1858_v60  ;;  %2155 = vst [vmem:[%s4516_s5 + $0x298] sm:$0xff] %v1859_v52  ;;  %v1738_v35 = vmul.f32 %v2098_v61, %v3549_v54  ;;  %v1739_v29 = vmul.f32 %v2099_v62, %v3549_v54  ;;  %v1862_v41 = vmax.f32 %v1798_v9, 0.0  ;;  %v1740_v53 = vmul.f32 %v2100_v31, %v3549_v54  ;;  %v2113_v62 = vld [vmem:[%s4516_s5 + $0x348] sm:$0xff]  ;;  %v2115_v36 = vld [vmem:[%s4516_s5 + $0x358] sm:$0xff] }
 0x2bd   : > { %2156 = vst [vmem:[%s4516_s5 + $0x2a0] sm:$0xff] %v1860_v58  ;;  %2157 = vst [vmem:[%s4516_s5 + $0x2a8] sm:$0xff] %v1861_v23  ;;  %v1863_v19 = vmax.f32 %v1799_v15, 0.0  ;;  %v1741_v57 = vmul.f32 %v2101_v2, %v3549_v54  ;;  %v1800_v17 = vadd.f32 %v1736_v38, %v3580_v49  ;;  %v1801_v8 = vadd.f32 %v1737_v27, %v3580_v49  ;;  %v2116_v58 = vld [vmem:[%s4516_s5 + $0x360] sm:$0xff]  ;;  %v2117_v23 = vld [vmem:[%s4516_s5 + $0x368] sm:$0xff] }
 0x2be   : > { %v1802_v30 = vadd.f32 %v1738_v35, %v3580_v49  ;;  %v1803_v39 = vadd.f32 %v1739_v29, %v3580_v49  ;;  %2158 = vst [vmem:[%s4516_s5 + $0x2b0] sm:$0xff] %v1862_v41  ;;  %v1804_v28 = vadd.f32 %v1740_v53, %v3580_v49  ;;  %v1742_v1 = vmul.f32 %v2102_v46, %v3549_v54  ;;  %v2118_v41 = vld [vmem:[%s4516_s5 + $0x370] sm:$0xff] }
 0x2bf   : > { %2159 = vst [vmem:[%s4516_s5 + $0x2b8] sm:$0xff] %v1863_v19  ;;  %v1805_v55 = vadd.f32 %v1741_v57, %v3580_v49  ;;  %v1743_v10 = vmul.f32 %v2103_v44, %v3549_v54  ;;  %v1864_v47 = vmax.f32 %v1800_v17, 0.0  ;;  %v1865_v48 = vmax.f32 %v1801_v8, 0.0  ;;  %v2119_v19 = vld [vmem:[%s4516_s5 + $0x378] sm:$0xff] }
 0x2c0   : > { %v1866_v59 = vmax.f32 %v1802_v30, 0.0  ;;  %v1867_v16 = vmax.f32 %v1803_v39, 0.0  ;;  %v1868_v43 = vmax.f32 %v1804_v28, 0.0  ;;  %v1806_v13 = vadd.f32 %v1742_v1, %v3580_v49 }
 0x2c1   : > { %v1869_v6 = vmax.f32 %v1805_v55, 0.0  ;;  %v1807_v34 = vadd.f32 %v1743_v10, %v3580_v49  ;;  %2160 = vst [vmem:[%s4516_s5 + $0x2c0] sm:$0xff] %v1864_v47  ;;  %2161 = vst [vmem:[%s4516_s5 + $0x2c8] sm:$0xff] %v1865_v48  ;;  %v1744_v45 = vmul.f32 %v2104_v4, %v3549_v54  ;;  %v1745_v42 = vmul.f32 %v2105_v26, %v3549_v54  ;;  %v2120_v55 = vld [vmem:[%s4516_s5 + $0x380] sm:$0xff]  ;;  %v2122_v47 = vld [vmem:[%s4516_s5 + $0x390] sm:$0xff] }
 0x2c2   : > { %2162 = vst [vmem:[%s4516_s5 + $0x2d0] sm:$0xff] %v1866_v59  ;;  %2163 = vst [vmem:[%s4516_s5 + $0x2d8] sm:$0xff] %v1867_v16  ;;  %v1746_v37 = vmul.f32 %v2106_v24, %v3549_v54  ;;  %v1747_v0 = vmul.f32 %v2107_v3, %v3549_v54  ;;  %v1870_v25 = vmax.f32 %v1806_v13, 0.0  ;;  %v1748_v12 = vmul.f32 %v2108_v56, %v3549_v54  ;;  %v2121_v3 = vld [vmem:[%s4516_s5 + $0x388] sm:$0xff]  ;;  %v2123_v48 = vld [vmem:[%s4516_s5 + $0x398] sm:$0xff] }
 0x2c3   : > { %2164 = vst [vmem:[%s4516_s5 + $0x2e0] sm:$0xff] %v1868_v43  ;;  %2165 = vst [vmem:[%s4516_s5 + $0x2e8] sm:$0xff] %v1869_v6  ;;  %v1871_v33 = vmax.f32 %v1807_v34, 0.0  ;;  %v1749_v32 = vmul.f32 %v2109_v40, %v3549_v54  ;;  %v1808_v51 = vadd.f32 %v1744_v45, %v3580_v49  ;;  %v1809_v14 = vadd.f32 %v1745_v42, %v3580_v49  ;;  %v2124_v43 = vld [vmem:[%s4516_s5 + $0x3a0] sm:$0xff]  ;;  %v2125_v6 = vld [vmem:[%s4516_s5 + $0x3a8] sm:$0xff] }
 0x2c4   : > { %v1810_v18 = vadd.f32 %v1746_v37, %v3580_v49  ;;  %v1811_v50 = vadd.f32 %v1747_v0, %v3580_v49  ;;  %2166 = vst [vmem:[%s4516_s5 + $0x2f0] sm:$0xff] %v1870_v25  ;;  %v1812_v22 = vadd.f32 %v1748_v12, %v3580_v49  ;;  %v1750_v7 = vmul.f32 %v2110_v21, %v3549_v54  ;;  %v2126_v25 = vld [vmem:[%s4516_s5 + $0x3b0] sm:$0xff] }
 0x2c5   : > { %2167 = vst [vmem:[%s4516_s5 + $0x2f8] sm:$0xff] %v1871_v33  ;;  %v1813_v11 = vadd.f32 %v1749_v32, %v3580_v49  ;;  %v1751_v61 = vmul.f32 %v2111_v5, %v3549_v54  ;;  %v1872_v60 = vmax.f32 %v1808_v51, 0.0  ;;  %v1873_v52 = vmax.f32 %v1809_v14, 0.0  ;;  %v2127_v33 = vld [vmem:[%s4516_s5 + $0x3b8] sm:$0xff] }
 0x2c6   : > { %v1874_v31 = vmax.f32 %v1810_v18, 0.0  ;;  %v1875_v2 = vmax.f32 %v1811_v50, 0.0  ;;  %v1876_v9 = vmax.f32 %v1812_v22, 0.0  ;;  %v1814_v38 = vadd.f32 %v1750_v7, %v3580_v49 }
 0x2c7   : > { %v1877_v15 = vmax.f32 %v1813_v11, 0.0  ;;  %v1815_v27 = vadd.f32 %v1751_v61, %v3580_v49  ;;  %2168 = vst [vmem:[%s4516_s5 + $0x300] sm:$0xff] %v1872_v60  ;;  %2169 = vst [vmem:[%s4516_s5 + $0x308] sm:$0xff] %v1873_v52  ;;  %v1752_v35 = vmul.f32 %v2112_v63, %v3549_v54  ;;  %v1753_v29 = vmul.f32 %v2113_v62, %v3549_v54  ;;  %v2128_v11 = vld [vmem:[%s4516_s5 + $0x3c0] sm:$0xff]  ;;  %v2130_v60 = vld [vmem:[%s4516_s5 + $0x3d0] sm:$0xff] }
 0x2c8   : > { %2170 = vst [vmem:[%s4516_s5 + $0x310] sm:$0xff] %v1874_v31  ;;  %2171 = vst [vmem:[%s4516_s5 + $0x318] sm:$0xff] %v1875_v2  ;;  %v1754_v46 = vmul.f32 %v2114_v20, %v3549_v54  ;;  %v1755_v44 = vmul.f32 %v2115_v36, %v3549_v54  ;;  %v1878_v53 = vmax.f32 %v1814_v38, 0.0  ;;  %v1756_v17 = vmul.f32 %v2116_v58, %v3549_v54  ;;  %v2129_v36 = vld [vmem:[%s4516_s5 + $0x3c8] sm:$0xff]  ;;  %v2131_v52 = vld [vmem:[%s4516_s5 + $0x3d8] sm:$0xff] }
 0x2c9   : > { %2172 = vst [vmem:[%s4516_s5 + $0x320] sm:$0xff] %v1876_v9  ;;  %2173 = vst [vmem:[%s4516_s5 + $0x328] sm:$0xff] %v1877_v15  ;;  %v1879_v57 = vmax.f32 %v1815_v27, 0.0  ;;  %v1757_v8 = vmul.f32 %v2117_v23, %v3549_v54  ;;  %v1816_v30 = vadd.f32 %v1752_v35, %v3580_v49  ;;  %v1817_v39 = vadd.f32 %v1753_v29, %v3580_v49  ;;  %v2132_v9 = vld [vmem:[%s4516_s5 + $0x3e0] sm:$0xff]  ;;  %v2133_v15 = vld [vmem:[%s4516_s5 + $0x3e8] sm:$0xff] }
 0x2ca   : > { %v1818_v4 = vadd.f32 %v1754_v46, %v3580_v49  ;;  %v1819_v28 = vadd.f32 %v1755_v44, %v3580_v49  ;;  %2174 = vst [vmem:[%s4516_s5 + $0x330] sm:$0xff] %v1878_v53  ;;  %v1820_v1 = vadd.f32 %v1756_v17, %v3580_v49  ;;  %v1758_v26 = vmul.f32 %v2118_v41, %v3549_v54  ;;  %v2134_v53 = vld [vmem:[%s4516_s5 + $0x3f0] sm:$0xff] }
 0x2cb   : > { %2175 = vst [vmem:[%s4516_s5 + $0x338] sm:$0xff] %v1879_v57  ;;  %v1821_v10 = vadd.f32 %v1757_v8, %v3580_v49  ;;  %v1759_v24 = vmul.f32 %v2119_v19, %v3549_v54  ;;  %v1880_v59 = vmax.f32 %v1816_v30, 0.0  ;;  %v1881_v16 = vmax.f32 %v1817_v39, 0.0  ;;  %v2135_v57 = vld [vmem:[%s4516_s5 + $0x3f8] sm:$0xff] }
 0x2cc   : > { %v1882_v56 = vmax.f32 %v1818_v4, 0.0  ;;  %v1883_v40 = vmax.f32 %v1819_v28, 0.0  ;;  %v1884_v13 = vmax.f32 %v1820_v1, 0.0  ;;  %v1822_v45 = vadd.f32 %v1758_v26, %v3580_v49 }
 0x2cd   : > { %v1885_v34 = vmax.f32 %v1821_v10, 0.0  ;;  %v1823_v42 = vadd.f32 %v1759_v24, %v3580_v49  ;;  %2176 = vst [vmem:[%s4516_s5 + $0x340] sm:$0xff] %v1880_v59  ;;  %2177 = vst [vmem:[%s4516_s5 + $0x348] sm:$0xff] %v1881_v16  ;;  %v1760_v37 = vmul.f32 %v2120_v55, %v3549_v54  ;;  %v1761_v0 = vmul.f32 %v2121_v3, %v3549_v54 }
 0x2ce   : > { %2178 = vst [vmem:[%s4516_s5 + $0x350] sm:$0xff] %v1882_v56  ;;  %2179 = vst [vmem:[%s4516_s5 + $0x358] sm:$0xff] %v1883_v40  ;;  %v1762_v21 = vmul.f32 %v2122_v47, %v3549_v54  ;;  %v1763_v5 = vmul.f32 %v2123_v48, %v3549_v54  ;;  %v1886_v12 = vmax.f32 %v1822_v45, 0.0  ;;  %v1764_v51 = vmul.f32 %v2124_v43, %v3549_v54 }
 0x2cf   : > { %2180 = vst [vmem:[%s4516_s5 + $0x360] sm:$0xff] %v1884_v13  ;;  %2181 = vst [vmem:[%s4516_s5 + $0x368] sm:$0xff] %v1885_v34  ;;  %v1887_v32 = vmax.f32 %v1823_v42, 0.0  ;;  %v1765_v14 = vmul.f32 %v2125_v6, %v3549_v54  ;;  %v1824_v18 = vadd.f32 %v1760_v37, %v3580_v49  ;;  %v1825_v50 = vadd.f32 %v1761_v0, %v3580_v49 }
 0x2d0   : > { %v1826_v63 = vadd.f32 %v1762_v21, %v3580_v49  ;;  %v1827_v22 = vadd.f32 %v1763_v5, %v3580_v49  ;;  %2182 = vst [vmem:[%s4516_s5 + $0x370] sm:$0xff] %v1886_v12  ;;  %v1828_v7 = vadd.f32 %v1764_v51, %v3580_v49  ;;  %v1766_v62 = vmul.f32 %v2126_v25, %v3549_v54 }
 0x2d1   : > { %2183 = vst [vmem:[%s4516_s5 + $0x378] sm:$0xff] %v1887_v32  ;;  %v1829_v61 = vadd.f32 %v1765_v14, %v3580_v49  ;;  %v1767_v20 = vmul.f32 %v2127_v33, %v3549_v54  ;;  %v1888_v31 = vmax.f32 %v1824_v18, 0.0  ;;  %v1889_v2 = vmax.f32 %v1825_v50, 0.0 }
 0x2d2   : > { %v1890_v58 = vmax.f32 %v1826_v63, 0.0  ;;  %v1891_v23 = vmax.f32 %v1827_v22, 0.0  ;;  %v1892_v38 = vmax.f32 %v1828_v7, 0.0  ;;  %v1830_v35 = vadd.f32 %v1766_v62, %v3580_v49 }
 0x2d3   : > { %v1893_v27 = vmax.f32 %v1829_v61, 0.0  ;;  %v1831_v29 = vadd.f32 %v1767_v20, %v3580_v49  ;;  %2184 = vst [vmem:[%s4516_s5 + $0x380] sm:$0xff] %v1888_v31  ;;  %2185 = vst [vmem:[%s4516_s5 + $0x388] sm:$0xff] %v1889_v2  ;;  %v1768_v46 = vmul.f32 %v2128_v11, %v3549_v54  ;;  %v1769_v44 = vmul.f32 %v2129_v36, %v3549_v54 }
 0x2d4   : > { %2186 = vst [vmem:[%s4516_s5 + $0x390] sm:$0xff] %v1890_v58  ;;  %2187 = vst [vmem:[%s4516_s5 + $0x398] sm:$0xff] %v1891_v23  ;;  %v1770_v41 = vmul.f32 %v2130_v60, %v3549_v54  ;;  %v1771_v19 = vmul.f32 %v2131_v52, %v3549_v54  ;;  %v1894_v17 = vmax.f32 %v1830_v35, 0.0  ;;  %v1772_v30 = vmul.f32 %v2132_v9, %v3549_v54 }
 0x2d5   : > { %2188 = vst [vmem:[%s4516_s5 + $0x3a0] sm:$0xff] %v1892_v38  ;;  %2189 = vst [vmem:[%s4516_s5 + $0x3a8] sm:$0xff] %v1893_v27  ;;  %v1895_v8 = vmax.f32 %v1831_v29, 0.0  ;;  %v1773_v39 = vmul.f32 %v2133_v15, %v3549_v54  ;;  %v1832_v4 = vadd.f32 %v1768_v46, %v3580_v49  ;;  %v1833_v28 = vadd.f32 %v1769_v44, %v3580_v49 }
 0x2d6   : > { %v1834_v55 = vadd.f32 %v1770_v41, %v3580_v49  ;;  %v1835_v1 = vadd.f32 %v1771_v19, %v3580_v49  ;;  %2190 = vst [vmem:[%s4516_s5 + $0x3b0] sm:$0xff] %v1894_v17  ;;  %v1836_v10 = vadd.f32 %v1772_v30, %v3580_v49  ;;  %v1774_v24 = vmul.f32 %v2134_v53, %v3549_v54 }
 0x2d7   : > { %2191 = vst [vmem:[%s4516_s5 + $0x3b8] sm:$0xff] %v1895_v8  ;;  %v1837_v26 = vadd.f32 %v1773_v39, %v3580_v49  ;;  %v1775_v3 = vmul.f32 %v2135_v57, %v3549_v54  ;;  %v1896_v47 = vmax.f32 %v1832_v4, 0.0  ;;  %v1897_v48 = vmax.f32 %v1833_v28, 0.0 }
 0x2d8   : > { %v1898_v59 = vmax.f32 %v1834_v55, 0.0  ;;  %v1899_v16 = vmax.f32 %v1835_v1, 0.0  ;;  %v1900_v56 = vmax.f32 %v1836_v10, 0.0  ;;  %v1838_v43 = vadd.f32 %v1774_v24, %v3580_v49 }
 0x2d9   : > { %v1901_v40 = vmax.f32 %v1837_v26, 0.0  ;;  %v1839_v6 = vadd.f32 %v1775_v3, %v3580_v49  ;;  %2192 = vst [vmem:[%s4516_s5 + $0x3c0] sm:$0xff] %v1896_v47  ;;  %2193 = vst [vmem:[%s4516_s5 + $0x3c8] sm:$0xff] %v1897_v48 }
 0x2da   : > { %2194 = vst [vmem:[%s4516_s5 + $0x3d0] sm:$0xff] %v1898_v59  ;;  %2195 = vst [vmem:[%s4516_s5 + $0x3d8] sm:$0xff] %v1899_v16  ;;  %v1902_v54 = vmax.f32 %v1838_v43, 0.0 }
 0x2db   : > { %2196 = vst [vmem:[%s4516_s5 + $0x3e0] sm:$0xff] %v1900_v56  ;;  %2197 = vst [vmem:[%s4516_s5 + $0x3e8] sm:$0xff] %v1901_v40  ;;  %v1903_v49 = vmax.f32 %v1839_v6, 0.0 }
 0x2dc   : > { %2198 = vst [vmem:[%s4516_s5 + $0x3f0] sm:$0xff] %v1902_v54 }
 0x2dd   : > { %2199 = vst [vmem:[%s4516_s5 + $0x3f8] sm:$0xff] %v1903_v49 }
 0x2de PF: > { %s15_s18 = sadd.s32 1, %s2506_s18  }
 0x2df   : > { %p12_p6 = scmp.ge.s32.totalorder %s15_s18, 4  }
 0x2e1   :  { %14 = sbr.rel (!%p12_p6) target bundleno = 1 (0x1), region = 76 }

</bundles_post_ra>
